<compile_context>
chip_gen: v7x
topology: tpu7x:2x2x1
jax: 0.10.0
libtpu: 0.0.40
codegen_flags: <defaults>
</compile_context>

<pallas_src>
import jax
import jax.numpy as jnp
import numpy as np
from jax.experimental import pallas as pl
from jax.experimental.pallas import tpu as pltpu

HIDDEN_DIM = 10
INPUT_DIM = 3
NUM_GATES = 4
GATE_PAD = 128          # each gate padded to its own 128-lane block
HP = 128                # hidden/cell state padded to one full lane dim


def lstm_tracker_kernel(x_ref, w_ih_ref, w_hh_ref, w_out_ref, b_out_ref,
                        out_ref, h_ref, c_ref, hstack_ref):
    """Whole LSTM recurrence + output projection in a single invocation.

    x_ref      : (T, Bp, D+1)   trajectory + constant-1 column (bias fold)
    w_ih_ref   : (D+1, 4*128)   input->gate weights (+ bias row), gate-aligned
    w_hh_ref   : (128, 4*128)   hidden->gate weights, gate-aligned
    w_out_ref  : (128, O)       hidden2pos weights (rows >= H are zero)
    b_out_ref  : (1, O)         hidden2pos bias
    out_ref    : (T*Bp, O)
    h_ref/c_ref: (Bp, 128)      persistent hidden / cell state (VMEM scratch)
    hstack_ref : (T, Bp, 128)   all hidden states for the final projection
    """
    T = x_ref.shape[0]
    Bp = h_ref.shape[0]
    GP = GATE_PAD

    h_ref[...] = jnp.zeros_like(h_ref)
    c_ref[...] = jnp.zeros_like(c_ref)

    # weights are loop-invariant: load once, reuse in every unrolled step
    w_ih = w_ih_ref[...]
    w_hh = w_hh_ref[...]

    def step(t, carry):
        x_t = x_ref[t]                                   # (Bp, D+1)
        h = h_ref[...]                                   # (Bp, 128)
        c = c_ref[...]                                   # (Bp, 128)

        # gates = [x, 1] @ [W_ih; b] + h @ W_hh   (bias folded into MXU op)
        gates = (jnp.dot(x_t, w_ih, preferred_element_type=jnp.float32)
                 + jnp.dot(h, w_hh, preferred_element_type=jnp.float32))

        # vreg-aligned gate slices; torch gate order i, f, g, o
        i_g = jax.nn.sigmoid(gates[:, 0 * GP:1 * GP])
        f_g = jax.nn.sigmoid(gates[:, 1 * GP:2 * GP])
        g_g = jnp.tanh(gates[:, 2 * GP:3 * GP])
        o_g = jax.nn.sigmoid(gates[:, 3 * GP:4 * GP])

        c_new = f_g * c + i_g * g_g
        h_new = o_g * jnp.tanh(c_new)

        c_ref[...] = c_new
        h_ref[...] = h_new
        hstack_ref[t] = h_new
        return carry

    jax.lax.fori_loop(0, T, step, 0, unroll=True)

    # hidden2pos: one lane-dense matmul + one store for the whole sequence
    h_all = hstack_ref[...].reshape(T * Bp, HP)
    out_ref[...] = (jnp.dot(h_all, w_out_ref[...],
                            preferred_element_type=jnp.float32)
                    + b_out_ref[...])


def pack_params(raw):
    """Repack torch-layout parameters into padded, gate-aligned kernel weights."""
    H = raw["w_hh"].shape[1]
    D = raw["w_ih"].shape[1]
    O = raw["w_out"].shape[0]
    GP = GATE_PAD

    w_ih = np.asarray(raw["w_ih"], np.float32)          # (4H, D)   torch weight_ih_l0
    w_hh = np.asarray(raw["w_hh"], np.float32)          # (4H, H)   torch weight_hh_l0
    b = (np.asarray(raw["b_ih"], np.float32)
         + np.asarray(raw["b_hh"], np.float32))         # (4H,)
    w_out = np.asarray(raw["w_out"], np.float32)        # (O, H)    hidden2pos.weight
    b_out = np.asarray(raw["b_out"], np.float32)        # (O,)      hidden2pos.bias

    w_ih_aug = np.zeros((D + 1, NUM_GATES * GP), np.float32)
    w_hh_pad = np.zeros((HP, NUM_GATES * GP), np.float32)
    for g in range(NUM_GATES):
        w_ih_aug[:D, g * GP:g * GP + H] = w_ih[g * H:(g + 1) * H, :].T
        w_ih_aug[D, g * GP:g * GP + H] = b[g * H:(g + 1) * H]      # bias row
        w_hh_pad[:H, g * GP:g * GP + H] = w_hh[g * H:(g + 1) * H, :].T

    w_out_pad = np.zeros((HP, O), np.float32)
    w_out_pad[:H, :] = w_out.T

    return {
        "w_ih": jnp.asarray(w_ih_aug),                  # (D+1, 512)
        "w_hh": jnp.asarray(w_hh_pad),                  # (128, 512)
        "w_out": jnp.asarray(w_out_pad),                # (128, O)
        "b_out": jnp.asarray(b_out[None, :]),           # (1, O)
    }


def lstm_tracker_forward(trajectory, packed):
    """trajectory: (T, B, D) float32 -> (T, B, O) float32."""
    T, B, D = trajectory.shape
    O = packed["w_out"].shape[1]
    Bp = max(8, ((B + 7) // 8) * 8)                     # full 8-sublane tile

    # pad batch to Bp and append a constant-1 column (folds the LSTM bias)
    x = jnp.zeros((T, Bp, D + 1), jnp.float32)
    x = x.at[:, :B, :D].set(trajectory.astype(jnp.float32))
    x = x.at[:, :, D].set(1.0)

    vmem = pl.BlockSpec(memory_space=pltpu.MemorySpace.VMEM)
    out = pl.pallas_call(
        lstm_tracker_kernel,
        out_shape=jax.ShapeDtypeStruct((T * Bp, O), jnp.float32),
        in_specs=[vmem, vmem, vmem, vmem, vmem],
        out_specs=vmem,
        scratch_shapes=[
            pltpu.VMEM((Bp, HP), jnp.float32),          # h
            pltpu.VMEM((Bp, HP), jnp.float32),          # c
            pltpu.VMEM((T, Bp, HP), jnp.float32),       # hidden-state stack
        ],
    )(x, packed["w_ih"], packed["w_hh"], packed["w_out"], packed["b_out"])

    return out.reshape(T, Bp, O)[:, :B, :]


def init_raw_params(key, hidden_dim=HIDDEN_DIM, input_dim=INPUT_DIM):
    """Deterministic init, same shapes / uniform range as torch defaults."""
    ks = jax.random.split(key, 6)
    bound = 1.0 / np.sqrt(hidden_dim)
    u = lambda k, shape: jax.random.uniform(k, shape, jnp.float32,
                                            minval=-bound, maxval=bound)
    return {
        "w_ih": u(ks[0], (4 * hidden_dim, input_dim)),
        "w_hh": u(ks[1], (4 * hidden_dim, hidden_dim)),
        "b_ih": u(ks[2], (4 * hidden_dim,)),
        "b_hh": u(ks[3], (4 * hidden_dim,)),
        "w_out": u(ks[4], (input_dim, hidden_dim)),
        "b_out": u(ks[5], (input_dim,)),
    }


def lstm_tracker_ref(trajectory, raw):
    """Pure-JAX reference (matches torch.nn.LSTM + Linear semantics)."""
    H = raw["w_hh"].shape[1]
    B = trajectory.shape[1]
    w_ih_t = raw["w_ih"].T
    w_hh_t = raw["w_hh"].T
    b = raw["b_ih"] + raw["b_hh"]

    def step(carry, x_t):
        h, c = carry
        gates = x_t @ w_ih_t + h @ w_hh_t + b
        i, f, g, o = jnp.split(gates, 4, axis=-1)
        i = jax.nn.sigmoid(i)
        f = jax.nn.sigmoid(f)
        g = jnp.tanh(g)
        o = jax.nn.sigmoid(o)
        c = f * c + i * g
        h = o * jnp.tanh(c)
        return (h, c), h

    init = (jnp.zeros((B, H), jnp.float32), jnp.zeros((B, H), jnp.float32))
    _, hs = jax.lax.scan(step, init, trajectory)
    return hs @ raw["w_out"].T + raw["b_out"]


if __name__ == "__main__":
    key = jax.random.PRNGKey(0)
    k_param, k_data = jax.random.split(key)

    seq_len, batch = 8, 2
    raw = init_raw_params(k_param)
    packed = pack_params(raw)
    trajectory = jax.random.normal(k_data, (seq_len, batch, INPUT_DIM),
                                   dtype=jnp.float32)

    out = jax.block_until_ready(lstm_tracker_forward(trajectory, packed))
    ref = jax.block_until_ready(lstm_tracker_ref(trajectory, raw))

    assert out.shape == (seq_len, batch, INPUT_DIM)
    assert np.allclose(np.asarray(out), np.asarray(ref), atol=1e-5, rtol=1e-5)

    print("KERNEL_OK")
</pallas_src>

<mosaic_0001>
module attributes {stable_mosaic.version = 11 : i64} {
  func.func @lstm_tracker_kernel(%arg0: memref<8x8x4xf32, #tpu.memory_space<vmem>>, %arg1: memref<4x512xf32, #tpu.memory_space<vmem>>, %arg2: memref<128x512xf32, #tpu.memory_space<vmem>>, %arg3: memref<128x3xf32, #tpu.memory_space<vmem>>, %arg4: memref<1x3xf32, #tpu.memory_space<vmem>>, %arg5: memref<64x3xf32, #tpu.memory_space<vmem>>, %arg6: memref<8x128xf32, #tpu.memory_space<vmem>>, %arg7: memref<8x128xf32, #tpu.memory_space<vmem>>, %arg8: memref<8x8x128xf32, #tpu.memory_space<vmem>>) attributes {dimension_semantics = [], scalar_prefetch = 0 : i64, scratch_operands = 3 : i64, tpu.core_type = #tpu.core_type<tc>} {
    %cst = arith.constant 0.000000e+00 : f32
    %0 = vector.broadcast %cst : f32 to vector<8x128xf32>
    %c0 = arith.constant 0 : index
    %c0_0 = arith.constant 0 : index
    %1 = vector.load %arg6[%c0, %c0_0] : memref<8x128xf32, #tpu.memory_space<vmem>>, vector<8x128xf32>
    tpu.vector_store %arg6[%c0, %c0_0], %0 {strides = array<i32>} : memref<8x128xf32, #tpu.memory_space<vmem>>, vector<8x128xf32>,
    %cst_1 = arith.constant 0.000000e+00 : f32
    %2 = vector.broadcast %cst_1 : f32 to vector<8x128xf32>
    %c0_2 = arith.constant 0 : index
    %c0_3 = arith.constant 0 : index
    %3 = vector.load %arg7[%c0_2, %c0_3] : memref<8x128xf32, #tpu.memory_space<vmem>>, vector<8x128xf32>
    tpu.vector_store %arg7[%c0_2, %c0_3], %2 {strides = array<i32>} : memref<8x128xf32, #tpu.memory_space<vmem>>, vector<8x128xf32>,
    %c0_4 = arith.constant 0 : index
    %c0_5 = arith.constant 0 : index
    %4 = vector.load %arg1[%c0_4, %c0_5] : memref<4x512xf32, #tpu.memory_space<vmem>>, vector<4x512xf32>
    %c0_6 = arith.constant 0 : index
    %c0_7 = arith.constant 0 : index
    %5 = vector.load %arg2[%c0_6, %c0_7] : memref<128x512xf32, #tpu.memory_space<vmem>>, vector<128x512xf32>
    %c0_i32 = arith.constant 0 : i32
    %6 = arith.index_cast %c0_i32 : i32 to index
    %c0_8 = arith.constant 0 : index
    %c0_9 = arith.constant 0 : index
    %7 = vector.load %arg0[%6, %c0_8, %c0_9] : memref<8x8x4xf32, #tpu.memory_space<vmem>>, vector<1x8x4xf32>
    %8 = vector.shape_cast %7 : vector<1x8x4xf32> to vector<8x4xf32>
    %c0_10 = arith.constant 0 : index
    %c0_11 = arith.constant 0 : index
    %9 = vector.load %arg6[%c0_10, %c0_11] : memref<8x128xf32, #tpu.memory_space<vmem>>, vector<8x128xf32>
    %c0_12 = arith.constant 0 : index
    %c0_13 = arith.constant 0 : index
    %10 = vector.load %arg7[%c0_12, %c0_13] : memref<8x128xf32, #tpu.memory_space<vmem>>, vector<8x128xf32>
    %cst_14 = arith.constant dense<0.000000e+00> : vector<8x512xf32>
    %11 = tpu.matmul %8, %4, %cst_14 {dimension_numbers = #tpu.dot_dimension_numbers<[1], [0], [0], [1], [0, 0, 1, 1], [], []>} : vector<8x4xf32>, vector<4x512xf32>, vector<8x512xf32> -> vector<8x512xf32>
    %cst_15 = arith.constant dense<0.000000e+00> : vector<8x512xf32>
    %12 = tpu.matmul %9, %5, %cst_15 {dimension_numbers = #tpu.dot_dimension_numbers<[1], [0], [0], [1], [0, 0, 1, 1], [], []>} : vector<8x128xf32>, vector<128x512xf32>, vector<8x512xf32> -> vector<8x512xf32>
    %13 = arith.addf %11, %12 : vector<8x512xf32>
    %14 = vector.extract_strided_slice %13 {offsets = [0, 0], sizes = [8, 128], strides = [1, 1]} : vector<8x512xf32> to vector<8x128xf32>
    %15 = arith.negf %14 : vector<8x128xf32>
    %16 = math.exp %15 : vector<8x128xf32>
    %cst_16 = arith.constant 1.000000e+00 : f32
    %17 = vector.broadcast %cst_16 : f32 to vector<8x128xf32>
    %18 = arith.addf %17, %16 : vector<8x128xf32>
    %19 = arith.divf %17, %18 : vector<8x128xf32>
    %20 = vector.extract_strided_slice %13 {offsets = [0, 128], sizes = [8, 128], strides = [1, 1]} : vector<8x512xf32> to vector<8x128xf32>
    %21 = arith.negf %20 : vector<8x128xf32>
    %22 = math.exp %21 : vector<8x128xf32>
    %cst_17 = arith.constant 1.000000e+00 : f32
    %23 = vector.broadcast %cst_17 : f32 to vector<8x128xf32>
    %24 = arith.addf %23, %22 : vector<8x128xf32>
    %25 = arith.divf %23, %24 : vector<8x128xf32>
    %26 = vector.extract_strided_slice %13 {offsets = [0, 256], sizes = [8, 128], strides = [1, 1]} : vector<8x512xf32> to vector<8x128xf32>
    %27 = math.tanh %26 : vector<8x128xf32>
    %28 = vector.extract_strided_slice %13 {offsets = [0, 384], sizes = [8, 128], strides = [1, 1]} : vector<8x512xf32> to vector<8x128xf32>
    %29 = arith.negf %28 : vector<8x128xf32>
    %30 = math.exp %29 : vector<8x128xf32>
    %cst_18 = arith.constant 1.000000e+00 : f32
    %31 = vector.broadcast %cst_18 : f32 to vector<8x128xf32>
    %32 = arith.addf %31, %30 : vector<8x128xf32>
    %33 = arith.divf %31, %32 : vector<8x128xf32>
    %34 = arith.mulf %25, %10 : vector<8x128xf32>
    %35 = arith.mulf %19, %27 : vector<8x128xf32>
    %36 = arith.addf %34, %35 : vector<8x128xf32>
    %37 = math.tanh %36 : vector<8x128xf32>
    %38 = arith.mulf %33, %37 : vector<8x128xf32>
    %c0_19 = arith.constant 0 : index
    %c0_20 = arith.constant 0 : index
    %39 = vector.load %arg7[%c0_19, %c0_20] : memref<8x128xf32, #tpu.memory_space<vmem>>, vector<8x128xf32>
    tpu.vector_store %arg7[%c0_19, %c0_20], %36 {strides = array<i32>} : memref<8x128xf32, #tpu.memory_space<vmem>>, vector<8x128xf32>,
    %c0_21 = arith.constant 0 : index
    %c0_22 = arith.constant 0 : index
    %40 = vector.load %arg6[%c0_21, %c0_22] : memref<8x128xf32, #tpu.memory_space<vmem>>, vector<8x128xf32>
    tpu.vector_store %arg6[%c0_21, %c0_22], %38 {strides = array<i32>} : memref<8x128xf32, #tpu.memory_space<vmem>>, vector<8x128xf32>,
    %41 = arith.index_cast %c0_i32 : i32 to index
    %c0_23 = arith.constant 0 : index
    %c0_24 = arith.constant 0 : index
    %42 = vector.load %arg8[%41, %c0_23, %c0_24] : memref<8x8x128xf32, #tpu.memory_space<vmem>>, vector<1x8x128xf32>
    %43 = vector.shape_cast %42 : vector<1x8x128xf32> to vector<8x128xf32>
    %44 = vector.shape_cast %38 : vector<8x128xf32> to vector<1x8x128xf32>
    tpu.vector_store %arg8[%41, %c0_23, %c0_24], %44 {strides = array<i32>} : memref<8x8x128xf32, #tpu.memory_space<vmem>>, vector<1x8x128xf32>,
    %c1_i32 = arith.constant 1 : i32
    %45 = arith.index_cast %c1_i32 : i32 to index
    %c0_25 = arith.constant 0 : index
    %c0_26 = arith.constant 0 : index
    %46 = vector.load %arg0[%45, %c0_25, %c0_26] : memref<8x8x4xf32, #tpu.memory_space<vmem>>, vector<1x8x4xf32>
    %47 = vector.shape_cast %46 : vector<1x8x4xf32> to vector<8x4xf32>
    %c0_27 = arith.constant 0 : index
    %c0_28 = arith.constant 0 : index
    %48 = vector.load %arg6[%c0_27, %c0_28] : memref<8x128xf32, #tpu.memory_space<vmem>>, vector<8x128xf32>
    %c0_29 = arith.constant 0 : index
    %c0_30 = arith.constant 0 : index
    %49 = vector.load %arg7[%c0_29, %c0_30] : memref<8x128xf32, #tpu.memory_space<vmem>>, vector<8x128xf32>
    %cst_31 = arith.constant dense<0.000000e+00> : vector<8x512xf32>
    %50 = tpu.matmul %47, %4, %cst_31 {dimension_numbers = #tpu.dot_dimension_numbers<[1], [0], [0], [1], [0, 0, 1, 1], [], []>} : vector<8x4xf32>, vector<4x512xf32>, vector<8x512xf32> -> vector<8x512xf32>
    %cst_32 = arith.constant dense<0.000000e+00> : vector<8x512xf32>
    %51 = tpu.matmul %48, %5, %cst_32 {dimension_numbers = #tpu.dot_dimension_numbers<[1], [0], [0], [1], [0, 0, 1, 1], [], []>} : vector<8x128xf32>, vector<128x512xf32>, vector<8x512xf32> -> vector<8x512xf32>
    %52 = arith.addf %50, %51 : vector<8x512xf32>
    %53 = vector.extract_strided_slice %52 {offsets = [0, 0], sizes = [8, 128], strides = [1, 1]} : vector<8x512xf32> to vector<8x128xf32>
    %54 = arith.negf %53 : vector<8x128xf32>
    %55 = math.exp %54 : vector<8x128xf32>
    %cst_33 = arith.constant 1.000000e+00 : f32
    %56 = vector.broadcast %cst_33 : f32 to vector<8x128xf32>
    %57 = arith.addf %56, %55 : vector<8x128xf32>
    %58 = arith.divf %56, %57 : vector<8x128xf32>
    %59 = vector.extract_strided_slice %52 {offsets = [0, 128], sizes = [8, 128], strides = [1, 1]} : vector<8x512xf32> to vector<8x128xf32>
    %60 = arith.negf %59 : vector<8x128xf32>
    %61 = math.exp %60 : vector<8x128xf32>
    %cst_34 = arith.constant 1.000000e+00 : f32
    %62 = vector.broadcast %cst_34 : f32 to vector<8x128xf32>
    %63 = arith.addf %62, %61 : vector<8x128xf32>
    %64 = arith.divf %62, %63 : vector<8x128xf32>
    %65 = vector.extract_strided_slice %52 {offsets = [0, 256], sizes = [8, 128], strides = [1, 1]} : vector<8x512xf32> to vector<8x128xf32>
    %66 = math.tanh %65 : vector<8x128xf32>
    %67 = vector.extract_strided_slice %52 {offsets = [0, 384], sizes = [8, 128], strides = [1, 1]} : vector<8x512xf32> to vector<8x128xf32>
    %68 = arith.negf %67 : vector<8x128xf32>
    %69 = math.exp %68 : vector<8x128xf32>
    %cst_35 = arith.constant 1.000000e+00 : f32
    %70 = vector.broadcast %cst_35 : f32 to vector<8x128xf32>
    %71 = arith.addf %70, %69 : vector<8x128xf32>
    %72 = arith.divf %70, %71 : vector<8x128xf32>
    %73 = arith.mulf %64, %49 : vector<8x128xf32>
    %74 = arith.mulf %58, %66 : vector<8x128xf32>
    %75 = arith.addf %73, %74 : vector<8x128xf32>
    %76 = math.tanh %75 : vector<8x128xf32>
    %77 = arith.mulf %72, %76 : vector<8x128xf32>
    %c0_36 = arith.constant 0 : index
    %c0_37 = arith.constant 0 : index
    %78 = vector.load %arg7[%c0_36, %c0_37] : memref<8x128xf32, #tpu.memory_space<vmem>>, vector<8x128xf32>
    tpu.vector_store %arg7[%c0_36, %c0_37], %75 {strides = array<i32>} : memref<8x128xf32, #tpu.memory_space<vmem>>, vector<8x128xf32>,
    %c0_38 = arith.constant 0 : index
    %c0_39 = arith.constant 0 : index
    %79 = vector.load %arg6[%c0_38, %c0_39] : memref<8x128xf32, #tpu.memory_space<vmem>>, vector<8x128xf32>
    tpu.vector_store %arg6[%c0_38, %c0_39], %77 {strides = array<i32>} : memref<8x128xf32, #tpu.memory_space<vmem>>, vector<8x128xf32>,
    %80 = arith.index_cast %c1_i32 : i32 to index
    %c0_40 = arith.constant 0 : index
    %c0_41 = arith.constant 0 : index
    %81 = vector.load %arg8[%80, %c0_40, %c0_41] : memref<8x8x128xf32, #tpu.memory_space<vmem>>, vector<1x8x128xf32>
    %82 = vector.shape_cast %81 : vector<1x8x128xf32> to vector<8x128xf32>
    %83 = vector.shape_cast %77 : vector<8x128xf32> to vector<1x8x128xf32>
    tpu.vector_store %arg8[%80, %c0_40, %c0_41], %83 {strides = array<i32>} : memref<8x8x128xf32, #tpu.memory_space<vmem>>, vector<1x8x128xf32>,
    %c2_i32 = arith.constant 2 : i32
    %84 = arith.index_cast %c2_i32 : i32 to index
    %c0_42 = arith.constant 0 : index
    %c0_43 = arith.constant 0 : index
    %85 = vector.load %arg0[%84, %c0_42, %c0_43] : memref<8x8x4xf32, #tpu.memory_space<vmem>>, vector<1x8x4xf32>
    %86 = vector.shape_cast %85 : vector<1x8x4xf32> to vector<8x4xf32>
    %c0_44 = arith.constant 0 : index
    %c0_45 = arith.constant 0 : index
    %87 = vector.load %arg6[%c0_44, %c0_45] : memref<8x128xf32, #tpu.memory_space<vmem>>, vector<8x128xf32>
    %c0_46 = arith.constant 0 : index
    %c0_47 = arith.constant 0 : index
    %88 = vector.load %arg7[%c0_46, %c0_47] : memref<8x128xf32, #tpu.memory_space<vmem>>, vector<8x128xf32>
    %cst_48 = arith.constant dense<0.000000e+00> : vector<8x512xf32>
    %89 = tpu.matmul %86, %4, %cst_48 {dimension_numbers = #tpu.dot_dimension_numbers<[1], [0], [0], [1], [0, 0, 1, 1], [], []>} : vector<8x4xf32>, vector<4x512xf32>, vector<8x512xf32> -> vector<8x512xf32>
    %cst_49 = arith.constant dense<0.000000e+00> : vector<8x512xf32>
    %90 = tpu.matmul %87, %5, %cst_49 {dimension_numbers = #tpu.dot_dimension_numbers<[1], [0], [0], [1], [0, 0, 1, 1], [], []>} : vector<8x128xf32>, vector<128x512xf32>, vector<8x512xf32> -> vector<8x512xf32>
    %91 = arith.addf %89, %90 : vector<8x512xf32>
    %92 = vector.extract_strided_slice %91 {offsets = [0, 0], sizes = [8, 128], strides = [1, 1]} : vector<8x512xf32> to vector<8x128xf32>
    %93 = arith.negf %92 : vector<8x128xf32>
    %94 = math.exp %93 : vector<8x128xf32>
    %cst_50 = arith.constant 1.000000e+00 : f32
    %95 = vector.broadcast %cst_50 : f32 to vector<8x128xf32>
    %96 = arith.addf %95, %94 : vector<8x128xf32>
    %97 = arith.divf %95, %96 : vector<8x128xf32>
    %98 = vector.extract_strided_slice %91 {offsets = [0, 128], sizes = [8, 128], strides = [1, 1]} : vector<8x512xf32> to vector<8x128xf32>
    %99 = arith.negf %98 : vector<8x128xf32>
    %100 = math.exp %99 : vector<8x128xf32>
    %cst_51 = arith.constant 1.000000e+00 : f32
    %101 = vector.broadcast %cst_51 : f32 to vector<8x128xf32>
    %102 = arith.addf %101, %100 : vector<8x128xf32>
    %103 = arith.divf %101, %102 : vector<8x128xf32>
    %104 = vector.extract_strided_slice %91 {offsets = [0, 256], sizes = [8, 128], strides = [1, 1]} : vector<8x512xf32> to vector<8x128xf32>
    %105 = math.tanh %104 : vector<8x128xf32>
    %106 = vector.extract_strided_slice %91 {offsets = [0, 384], sizes = [8, 128], strides = [1, 1]} : vector<8x512xf32> to vector<8x128xf32>
    %107 = arith.negf %106 : vector<8x128xf32>
    %108 = math.exp %107 : vector<8x128xf32>
    %cst_52 = arith.constant 1.000000e+00 : f32
    %109 = vector.broadcast %cst_52 : f32 to vector<8x128xf32>
    %110 = arith.addf %109, %108 : vector<8x128xf32>
    %111 = arith.divf %109, %110 : vector<8x128xf32>
    %112 = arith.mulf %103, %88 : vector<8x128xf32>
    %113 = arith.mulf %97, %105 : vector<8x128xf32>
    %114 = arith.addf %112, %113 : vector<8x128xf32>
    %115 = math.tanh %114 : vector<8x128xf32>
    %116 = arith.mulf %111, %115 : vector<8x128xf32>
    %c0_53 = arith.constant 0 : index
    %c0_54 = arith.constant 0 : index
    %117 = vector.load %arg7[%c0_53, %c0_54] : memref<8x128xf32, #tpu.memory_space<vmem>>, vector<8x128xf32>
    tpu.vector_store %arg7[%c0_53, %c0_54], %114 {strides = array<i32>} : memref<8x128xf32, #tpu.memory_space<vmem>>, vector<8x128xf32>,
    %c0_55 = arith.constant 0 : index
    %c0_56 = arith.constant 0 : index
    %118 = vector.load %arg6[%c0_55, %c0_56] : memref<8x128xf32, #tpu.memory_space<vmem>>, vector<8x128xf32>
    tpu.vector_store %arg6[%c0_55, %c0_56], %116 {strides = array<i32>} : memref<8x128xf32, #tpu.memory_space<vmem>>, vector<8x128xf32>,
    %119 = arith.index_cast %c2_i32 : i32 to index
    %c0_57 = arith.constant 0 : index
    %c0_58 = arith.constant 0 : index
    %120 = vector.load %arg8[%119, %c0_57, %c0_58] : memref<8x8x128xf32, #tpu.memory_space<vmem>>, vector<1x8x128xf32>
    %121 = vector.shape_cast %120 : vector<1x8x128xf32> to vector<8x128xf32>
    %122 = vector.shape_cast %116 : vector<8x128xf32> to vector<1x8x128xf32>
    tpu.vector_store %arg8[%119, %c0_57, %c0_58], %122 {strides = array<i32>} : memref<8x8x128xf32, #tpu.memory_space<vmem>>, vector<1x8x128xf32>,
    %c3_i32 = arith.constant 3 : i32
    %123 = arith.index_cast %c3_i32 : i32 to index
    %c0_59 = arith.constant 0 : index
    %c0_60 = arith.constant 0 : index
    %124 = vector.load %arg0[%123, %c0_59, %c0_60] : memref<8x8x4xf32, #tpu.memory_space<vmem>>, vector<1x8x4xf32>
    %125 = vector.shape_cast %124 : vector<1x8x4xf32> to vector<8x4xf32>
    %c0_61 = arith.constant 0 : index
    %c0_62 = arith.constant 0 : index
    %126 = vector.load %arg6[%c0_61, %c0_62] : memref<8x128xf32, #tpu.memory_space<vmem>>, vector<8x128xf32>
    %c0_63 = arith.constant 0 : index
    %c0_64 = arith.constant 0 : index
    %127 = vector.load %arg7[%c0_63, %c0_64] : memref<8x128xf32, #tpu.memory_space<vmem>>, vector<8x128xf32>
    %cst_65 = arith.constant dense<0.000000e+00> : vector<8x512xf32>
    %128 = tpu.matmul %125, %4, %cst_65 {dimension_numbers = #tpu.dot_dimension_numbers<[1], [0], [0], [1], [0, 0, 1, 1], [], []>} : vector<8x4xf32>, vector<4x512xf32>, vector<8x512xf32> -> vector<8x512xf32>
    %cst_66 = arith.constant dense<0.000000e+00> : vector<8x512xf32>
    %129 = tpu.matmul %126, %5, %cst_66 {dimension_numbers = #tpu.dot_dimension_numbers<[1], [0], [0], [1], [0, 0, 1, 1], [], []>} : vector<8x128xf32>, vector<128x512xf32>, vector<8x512xf32> -> vector<8x512xf32>
    %130 = arith.addf %128, %129 : vector<8x512xf32>
    %131 = vector.extract_strided_slice %130 {offsets = [0, 0], sizes = [8, 128], strides = [1, 1]} : vector<8x512xf32> to vector<8x128xf32>
    %132 = arith.negf %131 : vector<8x128xf32>
    %133 = math.exp %132 : vector<8x128xf32>
    %cst_67 = arith.constant 1.000000e+00 : f32
    %134 = vector.broadcast %cst_67 : f32 to vector<8x128xf32>
    %135 = arith.addf %134, %133 : vector<8x128xf32>
    %136 = arith.divf %134, %135 : vector<8x128xf32>
    %137 = vector.extract_strided_slice %130 {offsets = [0, 128], sizes = [8, 128], strides = [1, 1]} : vector<8x512xf32> to vector<8x128xf32>
    %138 = arith.negf %137 : vector<8x128xf32>
    %139 = math.exp %138 : vector<8x128xf32>
    %cst_68 = arith.constant 1.000000e+00 : f32
    %140 = vector.broadcast %cst_68 : f32 to vector<8x128xf32>
    %141 = arith.addf %140, %139 : vector<8x128xf32>
    %142 = arith.divf %140, %141 : vector<8x128xf32>
    %143 = vector.extract_strided_slice %130 {offsets = [0, 256], sizes = [8, 128], strides = [1, 1]} : vector<8x512xf32> to vector<8x128xf32>
    %144 = math.tanh %143 : vector<8x128xf32>
    %145 = vector.extract_strided_slice %130 {offsets = [0, 384], sizes = [8, 128], strides = [1, 1]} : vector<8x512xf32> to vector<8x128xf32>
    %146 = arith.negf %145 : vector<8x128xf32>
    %147 = math.exp %146 : vector<8x128xf32>
    %cst_69 = arith.constant 1.000000e+00 : f32
    %148 = vector.broadcast %cst_69 : f32 to vector<8x128xf32>
    %149 = arith.addf %148, %147 : vector<8x128xf32>
    %150 = arith.divf %148, %149 : vector<8x128xf32>
    %151 = arith.mulf %142, %127 : vector<8x128xf32>
    %152 = arith.mulf %136, %144 : vector<8x128xf32>
    %153 = arith.addf %151, %152 : vector<8x128xf32>
    %154 = math.tanh %153 : vector<8x128xf32>
    %155 = arith.mulf %150, %154 : vector<8x128xf32>
    %c0_70 = arith.constant 0 : index
    %c0_71 = arith.constant 0 : index
    %156 = vector.load %arg7[%c0_70, %c0_71] : memref<8x128xf32, #tpu.memory_space<vmem>>, vector<8x128xf32>
    tpu.vector_store %arg7[%c0_70, %c0_71], %153 {strides = array<i32>} : memref<8x128xf32, #tpu.memory_space<vmem>>, vector<8x128xf32>,
    %c0_72 = arith.constant 0 : index
    %c0_73 = arith.constant 0 : index
    %157 = vector.load %arg6[%c0_72, %c0_73] : memref<8x128xf32, #tpu.memory_space<vmem>>, vector<8x128xf32>
    tpu.vector_store %arg6[%c0_72, %c0_73], %155 {strides = array<i32>} : memref<8x128xf32, #tpu.memory_space<vmem>>, vector<8x128xf32>,
    %158 = arith.index_cast %c3_i32 : i32 to index
    %c0_74 = arith.constant 0 : index
    %c0_75 = arith.constant 0 : index
    %159 = vector.load %arg8[%158, %c0_74, %c0_75] : memref<8x8x128xf32, #tpu.memory_space<vmem>>, vector<1x8x128xf32>
    %160 = vector.shape_cast %159 : vector<1x8x128xf32> to vector<8x128xf32>
    %161 = vector.shape_cast %155 : vector<8x128xf32> to vector<1x8x128xf32>
    tpu.vector_store %arg8[%158, %c0_74, %c0_75], %161 {strides = array<i32>} : memref<8x8x128xf32, #tpu.memory_space<vmem>>, vector<1x8x128xf32>,
    %c4_i32 = arith.constant 4 : i32
    %162 = arith.index_cast %c4_i32 : i32 to index
    %c0_76 = arith.constant 0 : index
    %c0_77 = arith.constant 0 : index
    %163 = vector.load %arg0[%162, %c0_76, %c0_77] : memref<8x8x4xf32, #tpu.memory_space<vmem>>, vector<1x8x4xf32>
    %164 = vector.shape_cast %163 : vector<1x8x4xf32> to vector<8x4xf32>
    %c0_78 = arith.constant 0 : index
    %c0_79 = arith.constant 0 : index
    %165 = vector.load %arg6[%c0_78, %c0_79] : memref<8x128xf32, #tpu.memory_space<vmem>>, vector<8x128xf32>
    %c0_80 = arith.constant 0 : index
    %c0_81 = arith.constant 0 : index
    %166 = vector.load %arg7[%c0_80, %c0_81] : memref<8x128xf32, #tpu.memory_space<vmem>>, vector<8x128xf32>
    %cst_82 = arith.constant dense<0.000000e+00> : vector<8x512xf32>
    %167 = tpu.matmul %164, %4, %cst_82 {dimension_numbers = #tpu.dot_dimension_numbers<[1], [0], [0], [1], [0, 0, 1, 1], [], []>} : vector<8x4xf32>, vector<4x512xf32>, vector<8x512xf32> -> vector<8x512xf32>
    %cst_83 = arith.constant dense<0.000000e+00> : vector<8x512xf32>
    %168 = tpu.matmul %165, %5, %cst_83 {dimension_numbers = #tpu.dot_dimension_numbers<[1], [0], [0], [1], [0, 0, 1, 1], [], []>} : vector<8x128xf32>, vector<128x512xf32>, vector<8x512xf32> -> vector<8x512xf32>
    %169 = arith.addf %167, %168 : vector<8x512xf32>
    %170 = vector.extract_strided_slice %169 {offsets = [0, 0], sizes = [8, 128], strides = [1, 1]} : vector<8x512xf32> to vector<8x128xf32>
    %171 = arith.negf %170 : vector<8x128xf32>
    %172 = math.exp %171 : vector<8x128xf32>
    %cst_84 = arith.constant 1.000000e+00 : f32
    %173 = vector.broadcast %cst_84 : f32 to vector<8x128xf32>
    %174 = arith.addf %173, %172 : vector<8x128xf32>
    %175 = arith.divf %173, %174 : vector<8x128xf32>
    %176 = vector.extract_strided_slice %169 {offsets = [0, 128], sizes = [8, 128], strides = [1, 1]} : vector<8x512xf32> to vector<8x128xf32>
    %177 = arith.negf %176 : vector<8x128xf32>
    %178 = math.exp %177 : vector<8x128xf32>
    %cst_85 = arith.constant 1.000000e+00 : f32
    %179 = vector.broadcast %cst_85 : f32 to vector<8x128xf32>
    %180 = arith.addf %179, %178 : vector<8x128xf32>
    %181 = arith.divf %179, %180 : vector<8x128xf32>
    %182 = vector.extract_strided_slice %169 {offsets = [0, 256], sizes = [8, 128], strides = [1, 1]} : vector<8x512xf32> to vector<8x128xf32>
    %183 = math.tanh %182 : vector<8x128xf32>
    %184 = vector.extract_strided_slice %169 {offsets = [0, 384], sizes = [8, 128], strides = [1, 1]} : vector<8x512xf32> to vector<8x128xf32>
    %185 = arith.negf %184 : vector<8x128xf32>
    %186 = math.exp %185 : vector<8x128xf32>
    %cst_86 = arith.constant 1.000000e+00 : f32
    %187 = vector.broadcast %cst_86 : f32 to vector<8x128xf32>
    %188 = arith.addf %187, %186 : vector<8x128xf32>
    %189 = arith.divf %187, %188 : vector<8x128xf32>
    %190 = arith.mulf %181, %166 : vector<8x128xf32>
    %191 = arith.mulf %175, %183 : vector<8x128xf32>
    %192 = arith.addf %190, %191 : vector<8x128xf32>
    %193 = math.tanh %192 : vector<8x128xf32>
    %194 = arith.mulf %189, %193 : vector<8x128xf32>
    %c0_87 = arith.constant 0 : index
    %c0_88 = arith.constant 0 : index
    %195 = vector.load %arg7[%c0_87, %c0_88] : memref<8x128xf32, #tpu.memory_space<vmem>>, vector<8x128xf32>
    tpu.vector_store %arg7[%c0_87, %c0_88], %192 {strides = array<i32>} : memref<8x128xf32, #tpu.memory_space<vmem>>, vector<8x128xf32>,
    %c0_89 = arith.constant 0 : index
    %c0_90 = arith.constant 0 : index
    %196 = vector.load %arg6[%c0_89, %c0_90] : memref<8x128xf32, #tpu.memory_space<vmem>>, vector<8x128xf32>
    tpu.vector_store %arg6[%c0_89, %c0_90], %194 {strides = array<i32>} : memref<8x128xf32, #tpu.memory_space<vmem>>, vector<8x128xf32>,
    %197 = arith.index_cast %c4_i32 : i32 to index
    %c0_91 = arith.constant 0 : index
    %c0_92 = arith.constant 0 : index
    %198 = vector.load %arg8[%197, %c0_91, %c0_92] : memref<8x8x128xf32, #tpu.memory_space<vmem>>, vector<1x8x128xf32>
    %199 = vector.shape_cast %198 : vector<1x8x128xf32> to vector<8x128xf32>
    %200 = vector.shape_cast %194 : vector<8x128xf32> to vector<1x8x128xf32>
    tpu.vector_store %arg8[%197, %c0_91, %c0_92], %200 {strides = array<i32>} : memref<8x8x128xf32, #tpu.memory_space<vmem>>, vector<1x8x128xf32>,
    %c5_i32 = arith.constant 5 : i32
    %201 = arith.index_cast %c5_i32 : i32 to index
    %c0_93 = arith.constant 0 : index
    %c0_94 = arith.constant 0 : index
    %202 = vector.load %arg0[%201, %c0_93, %c0_94] : memref<8x8x4xf32, #tpu.memory_space<vmem>>, vector<1x8x4xf32>
    %203 = vector.shape_cast %202 : vector<1x8x4xf32> to vector<8x4xf32>
    %c0_95 = arith.constant 0 : index
    %c0_96 = arith.constant 0 : index
    %204 = vector.load %arg6[%c0_95, %c0_96] : memref<8x128xf32, #tpu.memory_space<vmem>>, vector<8x128xf32>
    %c0_97 = arith.constant 0 : index
    %c0_98 = arith.constant 0 : index
    %205 = vector.load %arg7[%c0_97, %c0_98] : memref<8x128xf32, #tpu.memory_space<vmem>>, vector<8x128xf32>
    %cst_99 = arith.constant dense<0.000000e+00> : vector<8x512xf32>
    %206 = tpu.matmul %203, %4, %cst_99 {dimension_numbers = #tpu.dot_dimension_numbers<[1], [0], [0], [1], [0, 0, 1, 1], [], []>} : vector<8x4xf32>, vector<4x512xf32>, vector<8x512xf32> -> vector<8x512xf32>
    %cst_100 = arith.constant dense<0.000000e+00> : vector<8x512xf32>
    %207 = tpu.matmul %204, %5, %cst_100 {dimension_numbers = #tpu.dot_dimension_numbers<[1], [0], [0], [1], [0, 0, 1, 1], [], []>} : vector<8x128xf32>, vector<128x512xf32>, vector<8x512xf32> -> vector<8x512xf32>
    %208 = arith.addf %206, %207 : vector<8x512xf32>
    %209 = vector.extract_strided_slice %208 {offsets = [0, 0], sizes = [8, 128], strides = [1, 1]} : vector<8x512xf32> to vector<8x128xf32>
    %210 = arith.negf %209 : vector<8x128xf32>
    %211 = math.exp %210 : vector<8x128xf32>
    %cst_101 = arith.constant 1.000000e+00 : f32
    %212 = vector.broadcast %cst_101 : f32 to vector<8x128xf32>
    %213 = arith.addf %212, %211 : vector<8x128xf32>
    %214 = arith.divf %212, %213 : vector<8x128xf32>
    %215 = vector.extract_strided_slice %208 {offsets = [0, 128], sizes = [8, 128], strides = [1, 1]} : vector<8x512xf32> to vector<8x128xf32>
    %216 = arith.negf %215 : vector<8x128xf32>
    %217 = math.exp %216 : vector<8x128xf32>
    %cst_102 = arith.constant 1.000000e+00 : f32
    %218 = vector.broadcast %cst_102 : f32 to vector<8x128xf32>
    %219 = arith.addf %218, %217 : vector<8x128xf32>
    %220 = arith.divf %218, %219 : vector<8x128xf32>
    %221 = vector.extract_strided_slice %208 {offsets = [0, 256], sizes = [8, 128], strides = [1, 1]} : vector<8x512xf32> to vector<8x128xf32>
    %222 = math.tanh %221 : vector<8x128xf32>
    %223 = vector.extract_strided_slice %208 {offsets = [0, 384], sizes = [8, 128], strides = [1, 1]} : vector<8x512xf32> to vector<8x128xf32>
    %224 = arith.negf %223 : vector<8x128xf32>
    %225 = math.exp %224 : vector<8x128xf32>
    %cst_103 = arith.constant 1.000000e+00 : f32
    %226 = vector.broadcast %cst_103 : f32 to vector<8x128xf32>
    %227 = arith.addf %226, %225 : vector<8x128xf32>
    %228 = arith.divf %226, %227 : vector<8x128xf32>
    %229 = arith.mulf %220, %205 : vector<8x128xf32>
    %230 = arith.mulf %214, %222 : vector<8x128xf32>
    %231 = arith.addf %229, %230 : vector<8x128xf32>
    %232 = math.tanh %231 : vector<8x128xf32>
    %233 = arith.mulf %228, %232 : vector<8x128xf32>
    %c0_104 = arith.constant 0 : index
    %c0_105 = arith.constant 0 : index
    %234 = vector.load %arg7[%c0_104, %c0_105] : memref<8x128xf32, #tpu.memory_space<vmem>>, vector<8x128xf32>
    tpu.vector_store %arg7[%c0_104, %c0_105], %231 {strides = array<i32>} : memref<8x128xf32, #tpu.memory_space<vmem>>, vector<8x128xf32>,
    %c0_106 = arith.constant 0 : index
    %c0_107 = arith.constant 0 : index
    %235 = vector.load %arg6[%c0_106, %c0_107] : memref<8x128xf32, #tpu.memory_space<vmem>>, vector<8x128xf32>
    tpu.vector_store %arg6[%c0_106, %c0_107], %233 {strides = array<i32>} : memref<8x128xf32, #tpu.memory_space<vmem>>, vector<8x128xf32>,
    %236 = arith.index_cast %c5_i32 : i32 to index
    %c0_108 = arith.constant 0 : index
    %c0_109 = arith.constant 0 : index
    %237 = vector.load %arg8[%236, %c0_108, %c0_109] : memref<8x8x128xf32, #tpu.memory_space<vmem>>, vector<1x8x128xf32>
    %238 = vector.shape_cast %237 : vector<1x8x128xf32> to vector<8x128xf32>
    %239 = vector.shape_cast %233 : vector<8x128xf32> to vector<1x8x128xf32>
    tpu.vector_store %arg8[%236, %c0_108, %c0_109], %239 {strides = array<i32>} : memref<8x8x128xf32, #tpu.memory_space<vmem>>, vector<1x8x128xf32>,
    %c6_i32 = arith.constant 6 : i32
    %240 = arith.index_cast %c6_i32 : i32 to index
    %c0_110 = arith.constant 0 : index
    %c0_111 = arith.constant 0 : index
    %241 = vector.load %arg0[%240, %c0_110, %c0_111] : memref<8x8x4xf32, #tpu.memory_space<vmem>>, vector<1x8x4xf32>
    %242 = vector.shape_cast %241 : vector<1x8x4xf32> to vector<8x4xf32>
    %c0_112 = arith.constant 0 : index
    %c0_113 = arith.constant 0 : index
    %243 = vector.load %arg6[%c0_112, %c0_113] : memref<8x128xf32, #tpu.memory_space<vmem>>, vector<8x128xf32>
    %c0_114 = arith.constant 0 : index
    %c0_115 = arith.constant 0 : index
    %244 = vector.load %arg7[%c0_114, %c0_115] : memref<8x128xf32, #tpu.memory_space<vmem>>, vector<8x128xf32>
    %cst_116 = arith.constant dense<0.000000e+00> : vector<8x512xf32>
    %245 = tpu.matmul %242, %4, %cst_116 {dimension_numbers = #tpu.dot_dimension_numbers<[1], [0], [0], [1], [0, 0, 1, 1], [], []>} : vector<8x4xf32>, vector<4x512xf32>, vector<8x512xf32> -> vector<8x512xf32>
    %cst_117 = arith.constant dense<0.000000e+00> : vector<8x512xf32>
    %246 = tpu.matmul %243, %5, %cst_117 {dimension_numbers = #tpu.dot_dimension_numbers<[1], [0], [0], [1], [0, 0, 1, 1], [], []>} : vector<8x128xf32>, vector<128x512xf32>, vector<8x512xf32> -> vector<8x512xf32>
    %247 = arith.addf %245, %246 : vector<8x512xf32>
    %248 = vector.extract_strided_slice %247 {offsets = [0, 0], sizes = [8, 128], strides = [1, 1]} : vector<8x512xf32> to vector<8x128xf32>
    %249 = arith.negf %248 : vector<8x128xf32>
    %250 = math.exp %249 : vector<8x128xf32>
    %cst_118 = arith.constant 1.000000e+00 : f32
    %251 = vector.broadcast %cst_118 : f32 to vector<8x128xf32>
    %252 = arith.addf %251, %250 : vector<8x128xf32>
    %253 = arith.divf %251, %252 : vector<8x128xf32>
    %254 = vector.extract_strided_slice %247 {offsets = [0, 128], sizes = [8, 128], strides = [1, 1]} : vector<8x512xf32> to vector<8x128xf32>
    %255 = arith.negf %254 : vector<8x128xf32>
    %256 = math.exp %255 : vector<8x128xf32>
    %cst_119 = arith.constant 1.000000e+00 : f32
    %257 = vector.broadcast %cst_119 : f32 to vector<8x128xf32>
    %258 = arith.addf %257, %256 : vector<8x128xf32>
    %259 = arith.divf %257, %258 : vector<8x128xf32>
    %260 = vector.extract_strided_slice %247 {offsets = [0, 256], sizes = [8, 128], strides = [1, 1]} : vector<8x512xf32> to vector<8x128xf32>
    %261 = math.tanh %260 : vector<8x128xf32>
    %262 = vector.extract_strided_slice %247 {offsets = [0, 384], sizes = [8, 128], strides = [1, 1]} : vector<8x512xf32> to vector<8x128xf32>
    %263 = arith.negf %262 : vector<8x128xf32>
    %264 = math.exp %263 : vector<8x128xf32>
    %cst_120 = arith.constant 1.000000e+00 : f32
    %265 = vector.broadcast %cst_120 : f32 to vector<8x128xf32>
    %266 = arith.addf %265, %264 : vector<8x128xf32>
    %267 = arith.divf %265, %266 : vector<8x128xf32>
    %268 = arith.mulf %259, %244 : vector<8x128xf32>
    %269 = arith.mulf %253, %261 : vector<8x128xf32>
    %270 = arith.addf %268, %269 : vector<8x128xf32>
    %271 = math.tanh %270 : vector<8x128xf32>
    %272 = arith.mulf %267, %271 : vector<8x128xf32>
    %c0_121 = arith.constant 0 : index
    %c0_122 = arith.constant 0 : index
    %273 = vector.load %arg7[%c0_121, %c0_122] : memref<8x128xf32, #tpu.memory_space<vmem>>, vector<8x128xf32>
    tpu.vector_store %arg7[%c0_121, %c0_122], %270 {strides = array<i32>} : memref<8x128xf32, #tpu.memory_space<vmem>>, vector<8x128xf32>,
    %c0_123 = arith.constant 0 : index
    %c0_124 = arith.constant 0 : index
    %274 = vector.load %arg6[%c0_123, %c0_124] : memref<8x128xf32, #tpu.memory_space<vmem>>, vector<8x128xf32>
    tpu.vector_store %arg6[%c0_123, %c0_124], %272 {strides = array<i32>} : memref<8x128xf32, #tpu.memory_space<vmem>>, vector<8x128xf32>,
    %275 = arith.index_cast %c6_i32 : i32 to index
    %c0_125 = arith.constant 0 : index
    %c0_126 = arith.constant 0 : index
    %276 = vector.load %arg8[%275, %c0_125, %c0_126] : memref<8x8x128xf32, #tpu.memory_space<vmem>>, vector<1x8x128xf32>
    %277 = vector.shape_cast %276 : vector<1x8x128xf32> to vector<8x128xf32>
    %278 = vector.shape_cast %272 : vector<8x128xf32> to vector<1x8x128xf32>
    tpu.vector_store %arg8[%275, %c0_125, %c0_126], %278 {strides = array<i32>} : memref<8x8x128xf32, #tpu.memory_space<vmem>>, vector<1x8x128xf32>,
    %c7_i32 = arith.constant 7 : i32
    %279 = arith.index_cast %c7_i32 : i32 to index
    %c0_127 = arith.constant 0 : index
    %c0_128 = arith.constant 0 : index
    %280 = vector.load %arg0[%279, %c0_127, %c0_128] : memref<8x8x4xf32, #tpu.memory_space<vmem>>, vector<1x8x4xf32>
    %281 = vector.shape_cast %280 : vector<1x8x4xf32> to vector<8x4xf32>
    %c0_129 = arith.constant 0 : index
    %c0_130 = arith.constant 0 : index
    %282 = vector.load %arg6[%c0_129, %c0_130] : memref<8x128xf32, #tpu.memory_space<vmem>>, vector<8x128xf32>
    %c0_131 = arith.constant 0 : index
    %c0_132 = arith.constant 0 : index
    %283 = vector.load %arg7[%c0_131, %c0_132] : memref<8x128xf32, #tpu.memory_space<vmem>>, vector<8x128xf32>
    %cst_133 = arith.constant dense<0.000000e+00> : vector<8x512xf32>
    %284 = tpu.matmul %281, %4, %cst_133 {dimension_numbers = #tpu.dot_dimension_numbers<[1], [0], [0], [1], [0, 0, 1, 1], [], []>} : vector<8x4xf32>, vector<4x512xf32>, vector<8x512xf32> -> vector<8x512xf32>
    %cst_134 = arith.constant dense<0.000000e+00> : vector<8x512xf32>
    %285 = tpu.matmul %282, %5, %cst_134 {dimension_numbers = #tpu.dot_dimension_numbers<[1], [0], [0], [1], [0, 0, 1, 1], [], []>} : vector<8x128xf32>, vector<128x512xf32>, vector<8x512xf32> -> vector<8x512xf32>
    %286 = arith.addf %284, %285 : vector<8x512xf32>
    %287 = vector.extract_strided_slice %286 {offsets = [0, 0], sizes = [8, 128], strides = [1, 1]} : vector<8x512xf32> to vector<8x128xf32>
    %288 = arith.negf %287 : vector<8x128xf32>
    %289 = math.exp %288 : vector<8x128xf32>
    %cst_135 = arith.constant 1.000000e+00 : f32
    %290 = vector.broadcast %cst_135 : f32 to vector<8x128xf32>
    %291 = arith.addf %290, %289 : vector<8x128xf32>
    %292 = arith.divf %290, %291 : vector<8x128xf32>
    %293 = vector.extract_strided_slice %286 {offsets = [0, 128], sizes = [8, 128], strides = [1, 1]} : vector<8x512xf32> to vector<8x128xf32>
    %294 = arith.negf %293 : vector<8x128xf32>
    %295 = math.exp %294 : vector<8x128xf32>
    %cst_136 = arith.constant 1.000000e+00 : f32
    %296 = vector.broadcast %cst_136 : f32 to vector<8x128xf32>
    %297 = arith.addf %296, %295 : vector<8x128xf32>
    %298 = arith.divf %296, %297 : vector<8x128xf32>
    %299 = vector.extract_strided_slice %286 {offsets = [0, 256], sizes = [8, 128], strides = [1, 1]} : vector<8x512xf32> to vector<8x128xf32>
    %300 = math.tanh %299 : vector<8x128xf32>
    %301 = vector.extract_strided_slice %286 {offsets = [0, 384], sizes = [8, 128], strides = [1, 1]} : vector<8x512xf32> to vector<8x128xf32>
    %302 = arith.negf %301 : vector<8x128xf32>
    %303 = math.exp %302 : vector<8x128xf32>
    %cst_137 = arith.constant 1.000000e+00 : f32
    %304 = vector.broadcast %cst_137 : f32 to vector<8x128xf32>
    %305 = arith.addf %304, %303 : vector<8x128xf32>
    %306 = arith.divf %304, %305 : vector<8x128xf32>
    %307 = arith.mulf %298, %283 : vector<8x128xf32>
    %308 = arith.mulf %292, %300 : vector<8x128xf32>
    %309 = arith.addf %307, %308 : vector<8x128xf32>
    %310 = math.tanh %309 : vector<8x128xf32>
    %311 = arith.mulf %306, %310 : vector<8x128xf32>
    %c0_138 = arith.constant 0 : index
    %c0_139 = arith.constant 0 : index
    %312 = vector.load %arg7[%c0_138, %c0_139] : memref<8x128xf32, #tpu.memory_space<vmem>>, vector<8x128xf32>
    tpu.vector_store %arg7[%c0_138, %c0_139], %309 {strides = array<i32>} : memref<8x128xf32, #tpu.memory_space<vmem>>, vector<8x128xf32>,
    %c0_140 = arith.constant 0 : index
    %c0_141 = arith.constant 0 : index
    %313 = vector.load %arg6[%c0_140, %c0_141] : memref<8x128xf32, #tpu.memory_space<vmem>>, vector<8x128xf32>
    tpu.vector_store %arg6[%c0_140, %c0_141], %311 {strides = array<i32>} : memref<8x128xf32, #tpu.memory_space<vmem>>, vector<8x128xf32>,
    %314 = arith.index_cast %c7_i32 : i32 to index
    %c0_142 = arith.constant 0 : index
    %c0_143 = arith.constant 0 : index
    %315 = vector.load %arg8[%314, %c0_142, %c0_143] : memref<8x8x128xf32, #tpu.memory_space<vmem>>, vector<1x8x128xf32>
    %316 = vector.shape_cast %315 : vector<1x8x128xf32> to vector<8x128xf32>
    %317 = vector.shape_cast %311 : vector<8x128xf32> to vector<1x8x128xf32>
    tpu.vector_store %arg8[%314, %c0_142, %c0_143], %317 {strides = array<i32>} : memref<8x8x128xf32, #tpu.memory_space<vmem>>, vector<1x8x128xf32>,
    %c8_i32 = arith.constant 8 : i32
    %c0_144 = arith.constant 0 : index
    %c0_145 = arith.constant 0 : index
    %c0_146 = arith.constant 0 : index
    %318 = vector.load %arg8[%c0_144, %c0_145, %c0_146] : memref<8x8x128xf32, #tpu.memory_space<vmem>>, vector<8x8x128xf32>
    %319 = vector.shape_cast %318 : vector<8x8x128xf32> to vector<64x128xf32>
    %c0_147 = arith.constant 0 : index
    %c0_148 = arith.constant 0 : index
    %320 = vector.load %arg3[%c0_147, %c0_148] : memref<128x3xf32, #tpu.memory_space<vmem>>, vector<128x3xf32>
    %cst_149 = arith.constant dense<0.000000e+00> : vector<64x3xf32>
    %321 = tpu.matmul %319, %320, %cst_149 {dimension_numbers = #tpu.dot_dimension_numbers<[1], [0], [0], [1], [0, 0, 1, 1], [], []>} : vector<64x128xf32>, vector<128x3xf32>, vector<64x3xf32> -> vector<64x3xf32>
    %c0_150 = arith.constant 0 : index
    %c0_151 = arith.constant 0 : index
    %322 = vector.load %arg4[%c0_150, %c0_151] : memref<1x3xf32, #tpu.memory_space<vmem>>, vector<1x3xf32>
    %323 = vector.broadcast %322 : vector<1x3xf32> to vector<64x3xf32>
    %324 = arith.addf %321, %323 : vector<64x3xf32>
    %c0_152 = arith.constant 0 : index
    %c0_153 = arith.constant 0 : index
    %325 = vector.load %arg5[%c0_152, %c0_153] : memref<64x3xf32, #tpu.memory_space<vmem>>, vector<64x3xf32>
    tpu.vector_store %arg5[%c0_152, %c0_153], %324 {strides = array<i32>} : memref<64x3xf32, #tpu.memory_space<vmem>>, vector<64x3xf32>,
    return
  }
}

</mosaic_0001>

<bundles_post_ra>
// kernel: tpu_custom_call.1
= control target key start
LH: loop header
LB: loop body
LE: loop exit
PB: predicated region body
PF: predicated region fallthrough
CT: control target
= control target key end

     0   :  { %10 = vsyncpa [#allocation6], 0  ;;  %s3700_s18 = smov [#allocation5]   ;;  %s4373_s0 = inlined_call_operand.vmem [shape: f32[8,8,4], index: 0, kind: input, shape index: {}]   ;;  %s4374_s1 = inlined_call_operand.vmem [shape: f32[4,512], index: 1, kind: input, shape index: {}]   ;;  %s4375_s2 = inlined_call_operand.hbm [shape: f32[128,512], index: 2, kind: input, shape index: {}]   ;;  %s4376_s3 = inlined_call_operand.vmem [shape: f32[128,3], index: 3, kind: input, shape index: {}]   ;;  %s4377_s4 = inlined_call_operand.vmem [shape: f32[1,3], index: 4, kind: input, shape index: {}]   ;;  %s4378_s5 = inlined_call_operand.vmem [shape: f32[64,3], index: 5, kind: output, shape index: {}]  }
   0x1   :  { %s20_s19 = sshll.u32 %s3700_s18, 4  ;;  %s3676_s22 = scalar_lea.hbm %s4375_s2, 8192  ;;  %s21_s19 = int_to_ptr.vmem [resolvable:$true] %s20_s19 }
   0x2   :  { %p3677_p0 = scmp.ne.s32.totalorder %s4375_s2, %s3676_s22  ;;  %p3680_p1 = scmp.lt.u32.totalorder %s3676_s22, %s4375_s2 }
   0x4   :  { %p3682_p2 = pnand %p3680_p1, %p3677_p0 }
   0x6   :  { %3685 = shalt.err (!%p3682_p2)
}
   0x7   :  { %s3686_s27 = scalar_lea.vmem %s21_s19, 8192  ;;  %p3691_p4 = scmp.lt.s32.totalorder %s21_s19, %s21_s19 }
   0x8   :  { %p3687_p3 = scmp.ne.s32.totalorder %s21_s19, %s3686_s27  ;;  %p3692_p5 = scmp.lt.s32.totalorder %s3686_s27, %s3686_s27 }
   0xa   :  { %p3693_p6 = por %p3692_p5, %p3691_p4 }
   0xc   :  { %p3694_p7 = pnand %p3693_p6, %p3687_p3 }
   0xe   :  { %3697 = shalt.err (!%p3694_p7)
}
   0xf   :  { %s3701_s28 = smov 512   ;;  %s3702_s29 = smov 32  }
  0x10   :  { %26 = dma.hbm_to_vmem [thread:$0]  %s4375_s2, 8192, %s21_s19, [#allocation6], %s3701_s28, %s3701_s28, %s3702_s29  }
  0x11   :  { %3698 = dma.done.wait [#allocation6], 8192  }
  0x12   :  { %3699 = vsyncadd [#allocation6], 4294959104  ;;  %v3703_v0 = vmov 0.0   ;;  %v39_v1 = vld [vmem:[#allocation5 + $0x8] sm:$0xff]  ;;  %v38_v3 = vld [vmem:[#allocation5] sm:$0xff]  ;;  %vm255_vm0 = vcmask 1043456  }
  0x13   :  { %169 = vmatprep.mubr.f32.mxu1 %v3703_v0  ;;  %328 = vmatprep.mubr.f32.mxu0 %v3703_v0  ;;  %v43_v2 = vld [vmem:[#allocation5 + $0x28] sm:$0xff]  ;;  %v42_v5 = vld [vmem:[#allocation5 + $0x20] sm:$0xff]  ;;  %vm251_vm1 = vcmask 31744   ;;  %v41_v53 = vld [vmem:[#allocation5 + $0x18] sm:$0xff]  ;;  %vm2802_vm2 = vcmask 23552  }
  0x14   :  { %v3748_v4 = vpack.c.bf16 %v43_v2, %v39_v1  ;;  %v47_v6 = vld [vmem:[#allocation5 + $0x48] sm:$0xff]  ;;  %v3750_v8 = vpack.c.bf16 %v42_v5, %v38_v3  ;;  %v46_v10 = vld [vmem:[#allocation5 + $0x40] sm:$0xff]  ;;  %v45_v54 = vld [vmem:[#allocation5 + $0x38] sm:$0xff] }
  0x15   :  { %v51_v7 = vld [vmem:[#allocation5 + $0x68] sm:$0xff]  ;;  %v50_v11 = vld [vmem:[#allocation5 + $0x60] sm:$0xff]  ;;  %v3831_v56 = vpack.c.bf16 %v45_v54, %v41_v53  ;;  %v40_v57 = vld [vmem:[#allocation5 + $0x10] sm:$0xff] }
  0x16   :  { %v3752_v9 = vpack.c.bf16 %v51_v7, %v47_v6  ;;  %v55_v12 = vld [vmem:[#allocation5 + $0x88] sm:$0xff]  ;;  %2965 = vmatprep.subr.bf16.mxu1 %v3748_v4  ;;  %v3756_v14 = vpack.c.bf16 %v50_v11, %v46_v10  ;;  %v54_v16 = vld [vmem:[#allocation5 + $0x80] sm:$0xff]  ;;  %v44_v58 = vld [vmem:[#allocation5 + $0x30] sm:$0xff] }
  0x17   :  { %v59_v13 = vld [vmem:[#allocation5 + $0xa8] sm:$0xff]  ;;  %2967 = vmatpush1.bf16.msra.mxu1 %v3750_v8  ;;  %v58_v17 = vld [vmem:[#allocation5 + $0xa0] sm:$0xff]  ;;  %v49_v59 = vld [vmem:[#allocation5 + $0x58] sm:$0xff]  ;;  %v3835_v61 = vpack.c.bf16 %v44_v58, %v40_v57 }
  0x18   :  { %2969 = vmatprep.subr.bf16.mxu1 %v3752_v9  ;;  %v3759_v15 = vpack.c.bf16 %v59_v13, %v55_v12  ;;  %v63_v18 = vld [vmem:[#allocation5 + $0xc8] sm:$0xff]  ;;  %v3762_v20 = vpack.c.bf16 %v58_v17, %v54_v16  ;;  %v62_v22 = vld [vmem:[#allocation5 + $0xc0] sm:$0xff]  ;;  %v53_v60 = vld [vmem:[#allocation5 + $0x78] sm:$0xff] }
  0x19   :  { %v67_v19 = vld [vmem:[#allocation5 + $0xe8] sm:$0xff]  ;;  %v66_v23 = vld [vmem:[#allocation5 + $0xe0] sm:$0xff]  ;;  %v3839_v62 = vpack.c.bf16 %v53_v60, %v49_v59  ;;  %v48_v63 = vld [vmem:[#allocation5 + $0x50] sm:$0xff] }
  0x1a   :  { %v3765_v21 = vpack.c.bf16 %v67_v19, %v63_v18  ;;  %v71_v24 = vld [vmem:[#allocation5 + $0x108] sm:$0xff]  ;;  %v3770_v26 = vld [vmem:[%s4374_s1] sm:$0xff]  ;;  %v3777_v28 = vpack.c.bf16 %v66_v23, %v62_v22  ;;  %v52_v1 = vld [vmem:[#allocation5 + $0x70] sm:$0xff] }
  0x1b   :  { %2971 = vmatpush1.bf16.msra.mxu1 %v3756_v14  ;;  %v75_v25 = vld [vmem:[#allocation5 + $0x128] sm:$0xff]  ;;  %v3774_v27 = vcombine.high %v3770_v26, %v3770_v26  ;;  %v102_v29 = vld [vmem:[%s4373_s0] sm:$0xff]  ;;  %v57_v2 = vld [vmem:[#allocation5 + $0x98] sm:$0xff]  ;;  %v3844_v5 = vpack.c.bf16 %v52_v1, %v48_v63 }
  0x1c   :  { %2973 = vmatprep.subr.bf16.mxu1 %v3759_v15  ;;  %v3783_v30 = vpack.c.bf16 %v75_v25, %v71_v24  ;;  %v70_v31 = vld [vmem:[#allocation5 + $0x100] sm:$0xff]  ;;  %v79_v33 = vld [vmem:[#allocation5 + $0x148] sm:$0xff]  ;;  %v61_v3 = vld [vmem:[#allocation5 + $0xb8] sm:$0xff] }
  0x1d   :  { %v74_v32 = vld [vmem:[#allocation5 + $0x120] sm:$0xff]  ;;  %2816 = vmatprep.subr.msk.mxu0 %vm255_vm0, %v3774_v27  ;;  %v83_v34 = vld [vmem:[#allocation5 + $0x168] sm:$0xff]  ;;  %v3848_v6 = vpack.c.bf16 %v61_v3, %v57_v2  ;;  %v56_v7 = vld [vmem:[#allocation5 + $0x90] sm:$0xff] }
  0x1e   :  { %2817 = vmatpush1.msk.msra.mxu0 %vm255_vm0, %v3770_v26  ;;  %v3791_v35 = vpack.c.bf16 %v74_v32, %v70_v31  ;;  %v3795_v36 = vpack.c.bf16 %v83_v34, %v79_v33  ;;  %v78_v37 = vld [vmem:[#allocation5 + $0x140] sm:$0xff]  ;;  %v87_v39 = vld [vmem:[#allocation5 + $0x188] sm:$0xff]  ;;  %v60_v10 = vld [vmem:[#allocation5 + $0xb0] sm:$0xff] }
  0x1f   :  { %2975 = vmatpush1.bf16.msra.mxu1 %v3762_v20  ;;  %2818 = vmatmul.mubr.msk.f32.vlgmr.msra.gmra.mrb[0].mxu0 %vm251_vm1, %v102_v29  ;;  %v82_v38 = vld [vmem:[#allocation5 + $0x160] sm:$0xff]  ;;  %v91_v40 = vld [vmem:[#allocation5 + $0x1a8] sm:$0xff]  ;;  %v65_v11 = vld [vmem:[#allocation5 + $0xd8] sm:$0xff]  ;;  %v3853_v13 = vpack.c.bf16 %v60_v10, %v56_v7 }
  0x20   :  { %2977 = vmatprep.subr.bf16.mxu1 %v3765_v21  ;;  %399 = vmatprep.mubr.f32.mxu0 %v3703_v0  ;;  %v3798_v41 = vpack.c.bf16 %v82_v38, %v78_v37  ;;  %v3803_v42 = vld [vmem:[%s4374_s1 + $0x8] sm:$0xff]  ;;  %v3806_v43 = vpack.c.bf16 %v91_v40, %v87_v39  ;;  %v86_v44 = vld [vmem:[#allocation5 + $0x180] sm:$0xff]  ;;  %v69_v12 = vld [vmem:[#allocation5 + $0xf8] sm:$0xff] }
  0x21   :  { %v90_v45 = vld [vmem:[#allocation5 + $0x1a0] sm:$0xff]  ;;  %v3810_v46 = vcombine.high %v3803_v42, %v3803_v42  ;;  %v95_v47 = vld [vmem:[#allocation5 + $0x1c8] sm:$0xff]  ;;  %v3857_v16 = vpack.c.bf16 %v69_v12, %v65_v11  ;;  %v64_v17 = vld [vmem:[#allocation5 + $0xd0] sm:$0xff] }
  0x22   :  { %v99_v48 = vld [vmem:[#allocation5 + $0x1e8] sm:$0xff]  ;;  %v3815_v49 = vpack.c.bf16 %v90_v45, %v86_v44  ;;  %v94_v51 = vld [vmem:[#allocation5 + $0x1c0] sm:$0xff]  ;;  %v68_v18 = vld [vmem:[#allocation5 + $0xf0] sm:$0xff] }
  0x23   :  { %2979 = vmatpush1.bf16.msra.mxu1 %v3777_v28  ;;  %2819 = vmatprep.subr.msk.mxu0 %vm255_vm0, %v3810_v46  ;;  %v3820_v50 = vpack.c.bf16 %v99_v48, %v95_v47  ;;  %v98_v52 = vld [vmem:[#allocation5 + $0x1e0] sm:$0xff]  ;;  %v73_v19 = vld [vmem:[#allocation5 + $0x118] sm:$0xff]  ;;  %v3861_v23 = vpack.c.bf16 %v68_v18, %v64_v17  ;;  %v72_v25 = vld [vmem:[#allocation5 + $0x110] sm:$0xff] }
  0x24   :  { %2981 = vmatprep.subr.bf16.mxu1 %v3783_v30  ;;  %2820 = vmatpush1.msk.msra.mxu0 %vm255_vm0, %v3803_v42  ;;  %v3827_v55 = vpack.c.bf16 %v98_v52, %v94_v51  ;;  %v77_v22 = vld [vmem:[#allocation5 + $0x138] sm:$0xff]  ;;  %v80_v37 = vld [vmem:[#allocation5 + $0x150] sm:$0xff] }
  0x25   :  { %2821 = vmatmul.mubr.msk.f32.vlgmr.msra.gmra.mrb[2].mxu0 %vm251_vm1, %v102_v29  ;;  %3029 = vmatprep.subr.bf16.mxu0 %v3748_v4  ;;  %v3865_v24 = vpack.c.bf16 %v77_v22, %v73_v19  ;;  %v76_v29 = vld [vmem:[#allocation5 + $0x130] sm:$0xff]  ;;  %v81_v31 = vld [vmem:[#allocation5 + $0x158] sm:$0xff] }
  0x26   :  { %501 = vmatprep.mubr.f32.mxu0 %v3703_v0  ;;  %3031 = vmatpush1.bf16.msra.mxu0 %v3750_v8  ;;  %v85_v32 = vld [vmem:[#allocation5 + $0x178] sm:$0xff]  ;;  %v3869_v33 = vpack.c.bf16 %v76_v29, %v72_v25  ;;  %v84_v38 = vld [vmem:[#allocation5 + $0x170] sm:$0xff] }
  0x27   :  { %2983 = vmatpush1.bf16.msra.mxu1 %v3791_v35  ;;  %3033 = vmatprep.subr.bf16.mxu0 %v3752_v9  ;;  %v3873_v34 = vpack.c.bf16 %v85_v32, %v81_v31  ;;  %v89_v39 = vld [vmem:[#allocation5 + $0x198] sm:$0xff]  ;;  %v3877_v44 = vpack.c.bf16 %v84_v38, %v80_v37  ;;  %v88_v47 = vld [vmem:[#allocation5 + $0x190] sm:$0xff] }
  0x28   :  { %2985 = vmatprep.subr.bf16.mxu1 %v3795_v36  ;;  %v93_v40 = vld [vmem:[#allocation5 + $0x1b8] sm:$0xff]  ;;  %v92_v48 = vld [vmem:[#allocation5 + $0x1b0] sm:$0xff] }
  0x29   :  { %v3881_v45 = vpack.c.bf16 %v93_v40, %v89_v39  ;;  %v97_v51 = vld [vmem:[#allocation5 + $0x1d8] sm:$0xff]  ;;  %v3885_v53 = vpack.c.bf16 %v92_v48, %v88_v47  ;;  %v96_v57 = vld [vmem:[#allocation5 + $0x1d0] sm:$0xff] }
  0x2a   :  { %3035 = vmatpush1.bf16.msra.mxu0 %v3756_v14  ;;  %v101_v52 = vld [vmem:[#allocation5 + $0x1f8] sm:$0xff]  ;;  %v100_v58 = vld [vmem:[#allocation5 + $0x1f0] sm:$0xff] }
  0x2b   :  { %2987 = vmatpush1.bf16.msra.mxu1 %v3798_v41  ;;  %3037 = vmatprep.subr.bf16.mxu0 %v3759_v15  ;;  %v3890_v54 = vpack.c.bf16 %v101_v52, %v97_v51  ;;  %v3893_v59 = vpack.c.bf16 %v100_v58, %v96_v57 }
  0x2c   :  { %2989 = vmatprep.subr.bf16.mxu1 %v3806_v43 }
  0x2e   :  { %3039 = vmatpush1.bf16.msra.mxu0 %v3762_v20 }
  0x2f   :  { %2991 = vmatpush1.bf16.msra.mxu1 %v3815_v49  ;;  %3041 = vmatprep.subr.bf16.mxu0 %v3765_v21 }
  0x30   :  { %2993 = vmatprep.subr.bf16.mxu1 %v3820_v50 }
  0x32   :  { %3043 = vmatpush1.bf16.msra.mxu0 %v3777_v28 }
  0x33   :  { %2995 = vmatpush1.bf16.msra.mxu1 %v3827_v55  ;;  %3045 = vmatprep.subr.bf16.mxu0 %v3783_v30 }
  0x34   :  { %2997 = vmatprep.subr.bf16.mxu1 %v3831_v56 }
  0x36   :  { %170 = vmatmul.mubr.f32.vlgmr.msra.gmra.mrb[0].mxu1 %v3703_v0  ;;  %3047 = vmatpush1.bf16.msra.mxu0 %v3791_v35 }
  0x37   :  { %2999 = vmatpush1.bf16.msra.mxu1 %v3835_v61  ;;  %240 = vmatprep.mubr.f32.mxu1 %v3703_v0 }
  0x38   :  { %3001 = vmatprep.subr.bf16.mxu1 %v3839_v62  ;;  %3049 = vmatprep.subr.bf16.mxu0 %v3795_v36 }
  0x3a   :  { %3051 = vmatpush1.bf16.msra.mxu0 %v3798_v41 }
  0x3b   :  { %3003 = vmatpush1.bf16.msra.mxu1 %v3844_v5  ;;  %3053 = vmatprep.subr.bf16.mxu0 %v3806_v43 }
  0x3c   :  { %3005 = vmatprep.subr.bf16.mxu1 %v3848_v6 }
  0x3e   :  { %3055 = vmatpush1.bf16.msra.mxu0 %v3815_v49 }
  0x3f   :  { %3007 = vmatpush1.bf16.msra.mxu1 %v3853_v13  ;;  %3057 = vmatprep.subr.bf16.mxu0 %v3820_v50 }
  0x40   :  { %3009 = vmatprep.subr.bf16.mxu1 %v3857_v16 }
  0x42   :  { %3059 = vmatpush1.bf16.msra.mxu0 %v3827_v55 }
  0x43   :  { %3011 = vmatpush1.bf16.msra.mxu1 %v3861_v23  ;;  %2826 = vmatprep.subr.msk.mxu0 %vm255_vm0, %v3774_v27 }
  0x44   :  { %3013 = vmatprep.subr.bf16.mxu1 %v3865_v24 }
  0x47   :  { %3015 = vmatpush1.bf16.msra.mxu1 %v3869_v33 }
  0x48   :  { %3017 = vmatprep.subr.bf16.mxu1 %v3873_v34 }
  0x4b   :  { %3019 = vmatpush1.bf16.msra.mxu1 %v3877_v44 }
  0x4c   :  { %3021 = vmatprep.subr.bf16.mxu1 %v3881_v45 }
  0x4f   :  { %3023 = vmatpush1.bf16.msra.mxu1 %v3885_v53 }
  0x50   :  { %3025 = vmatprep.subr.bf16.mxu1 %v3890_v54 }
  0x53   :  { %3027 = vmatpush1.bf16.msra.mxu1 %v3893_v59 }
  0x54   :  { %3061 = vmatprep.subr.bf16.mxu1 %v3831_v56 }
  0x56   :  { %241 = vmatmul.mubr.f32.vlgmr.msra.gmra.mrb[2].mxu1 %v3703_v0 }
  0x57   :  { %3063 = vmatpush1.bf16.msra.mxu1 %v3835_v61  ;;  %572 = vmatprep.mubr.f32.mxu1 %v3703_v0 }
  0x58   :  { %3065 = vmatprep.subr.bf16.mxu1 %v3839_v62 }
  0x5b   :  { %3067 = vmatpush1.bf16.msra.mxu1 %v3844_v5 }
  0x5c   :  { %3069 = vmatprep.subr.bf16.mxu1 %v3848_v6 }
  0x5f   :  { %3071 = vmatpush1.bf16.msra.mxu1 %v3853_v13 }
  0x60   :  { %3073 = vmatprep.subr.bf16.mxu1 %v3857_v16 }
  0x63   :  { %3075 = vmatpush1.bf16.msra.mxu1 %v3861_v23 }
  0x64   :  { %3077 = vmatprep.subr.bf16.mxu1 %v3865_v24 }
  0x67   :  { %3079 = vmatpush1.bf16.msra.mxu1 %v3869_v33 }
  0x68   :  { %3081 = vmatprep.subr.bf16.mxu1 %v3873_v34 }
  0x6b   :  { %3083 = vmatpush1.bf16.msra.mxu1 %v3877_v44 }
  0x6c   :  { %3085 = vmatprep.subr.bf16.mxu1 %v3881_v45 }
  0x6f   :  { %3087 = vmatpush1.bf16.msra.mxu1 %v3885_v53 }
  0x70   :  { %3089 = vmatprep.subr.bf16.mxu1 %v3890_v54 }
  0x73   :  { %3091 = vmatpush1.bf16.msra.mxu1 %v3893_v59 }
  0x74   :  { %3125 = vmatprep.subr.bf16.mxu1 %v3831_v56 }
  0xf2   :  { %v330_v60 = vpop.f32.mrb[0].mxu0 }
  0xf3   :  { %v332_v63 = vpop.f32.mrb[1].mxu0 }
  0xf8   :  { %v401_v1 = vpop.f32.mrb[2].mxu0 }
  0xf9   :  { %v403_v2 = vpop.f32.mrb[3].mxu0 }
 0x109   :  { %v171_v3 = vpop.f32.mrb[0].mxu1 }
 0x10a   :  { %v331_v7 = vadd.f32 %v330_v60, %v171_v3  ;;  %v173_v10 = vpop.f32.mrb[1].mxu1 }
 0x10b   :  { %v333_v11 = vadd.f32 %v332_v63, %v173_v10 }
 0x10c   :  { %v2822_v17 = vmul.f32 -1.442695, %v331_v7 }
 0x10d   :  { %v2823_v12 = vmul.f32 -1.442695, %v333_v11 }
 0x10f   :  { %3546 = vpow2.f32 %v2823_v12 }
 0x110   :  { %3548 = vpow2.f32 %v2822_v17 }
 0x119   :  { %v3547_v18 = vpop.eup %3546 }
 0x11a   :  { %v3549_v19 = vpop.eup %3548  ;;  %v415_v22 = vadd.f32 1.0, %v3547_v18 }
 0x11b   :  { %v409_v25 = vadd.f32 1.0, %v3549_v19 }
 0x11c   :  { %3550 = vrcp.f32 %v415_v22 }
 0x11d   :  { %3552 = vrcp.f32 %v409_v25 }
 0x126   :  { %v3551_v39 = vpop.eup %3550 }
 0x127   :  { %v3553_v40 = vpop.eup %3552  ;;  %v425_v48 = vmul.f32 0.0, %v3551_v39 }
 0x129   :  { %v242_v29 = vpop.f32.mrb[2].mxu1 }
 0x12a   :  { %v402_v31 = vadd.f32 %v401_v1, %v242_v29  ;;  %v244_v32 = vpop.f32.mrb[3].mxu1 }
 0x12b   :  { %v404_v37 = vadd.f32 %v403_v2, %v244_v32  ;;  %v2825_v2 = vld [vmem:[%s4373_s0 + $0x8] sm:$0xff] }
 0x12c   :  { %3554 = vtanh.f32 %v402_v31 }
 0x12d   :  { %v2824_v38 = vmul.f32 -1.442695, %v404_v37 }
 0x12f   :  { %3556 = vpow2.f32 %v2824_v38 }
 0x136   :  { %v3555_v47 = vpop.eup %3554 }
 0x137   :  { %v426_v51 = vmul.f32 %v3555_v47, %v3553_v40 }
 0x139   :  { %v3557_v52 = vpop.eup %3556  ;;  %v3916_v57 = vadd.f32 %v426_v51, %v425_v48 }
 0x13a   :  { %v422_v58 = vadd.f32 1.0, %v3557_v52 }
 0x13b   :  { %3558 = vtanh.f32 %v3916_v57 }
 0x13c   :  { %3560 = vrcp.f32 %v422_v58 }
 0x145   :  { %v3559_v60 = vpop.eup %3558 }
 0x146   :  { %v3561_v63 = vpop.eup %3560 }
 0x147   :  { %v3919_v1 = vmul.f32 %v3561_v63, %v3559_v60 }
 0x149   :  { %502 = vmatmul.mubr.f32.vlgmr.msra.gmra.mrb[4].mxu0 %v3919_v1  ;;  %573 = vmatmul.mubr.f32.vlgmr.msra.gmra.mrb[4].mxu1 %v3919_v1 }
 0x14a   :  { %2827 = vmatpush1.msk.msra.mxu0 %vm255_vm0, %v3770_v26  ;;  %646 = vmatprep.mubr.f32.mxu0 %v3703_v0 }
 0x14b   :  { %2829 = vmatprep.subr.msk.mxu0 %vm255_vm0, %v3810_v46  ;;  %3127 = vmatpush1.bf16.msra.mxu1 %v3835_v61 }
 0x14c   :  { %3129 = vmatprep.subr.bf16.mxu1 %v3839_v62  ;;  %891 = vmatprep.mubr.f32.mxu1 %v3703_v0 }
 0x14f   :  { %3131 = vmatpush1.bf16.msra.mxu1 %v3844_v5 }
 0x150   :  { %3133 = vmatprep.subr.bf16.mxu1 %v3848_v6 }
 0x151   :  { %2828 = vmatmul.mubr.msk.f32.vlgmr.msra.gmra.mrb[4].mxu0 %vm251_vm1, %v2825_v2 }
 0x152   :  { %2830 = vmatpush1.msk.msra.mxu0 %vm255_vm0, %v3803_v42  ;;  %717 = vmatprep.mubr.f32.mxu0 %v3703_v0 }
 0x153   :  { %3093 = vmatprep.subr.bf16.mxu0 %v3748_v4  ;;  %3135 = vmatpush1.bf16.msra.mxu1 %v3853_v13 }
 0x154   :  { %3137 = vmatprep.subr.bf16.mxu1 %v3857_v16 }
 0x155   :  { %2831 = vmatmul.mubr.msk.f32.vlgmr.msra.gmra.mrb[6].mxu0 %vm251_vm1, %v2825_v2 }
 0x156   :  { %3095 = vmatpush1.bf16.msra.mxu0 %v3750_v8  ;;  %820 = vmatprep.mubr.f32.mxu0 %v3703_v0 }
 0x157   :  { %3097 = vmatprep.subr.bf16.mxu0 %v3752_v9  ;;  %3139 = vmatpush1.bf16.msra.mxu1 %v3861_v23 }
 0x158   :  { %3141 = vmatprep.subr.bf16.mxu1 %v3865_v24 }
 0x15a   :  { %3099 = vmatpush1.bf16.msra.mxu0 %v3756_v14 }
 0x15b   :  { %3101 = vmatprep.subr.bf16.mxu0 %v3759_v15  ;;  %3143 = vmatpush1.bf16.msra.mxu1 %v3869_v33 }
 0x15c   :  { %3145 = vmatprep.subr.bf16.mxu1 %v3873_v34 }
 0x15e   :  { %3103 = vmatpush1.bf16.msra.mxu0 %v3762_v20 }
 0x15f   :  { %3105 = vmatprep.subr.bf16.mxu0 %v3765_v21  ;;  %3147 = vmatpush1.bf16.msra.mxu1 %v3877_v44 }
 0x160   :  { %3149 = vmatprep.subr.bf16.mxu1 %v3881_v45 }
 0x162   :  { %3107 = vmatpush1.bf16.msra.mxu0 %v3777_v28 }
 0x163   :  { %3109 = vmatprep.subr.bf16.mxu0 %v3783_v30  ;;  %3151 = vmatpush1.bf16.msra.mxu1 %v3885_v53 }
 0x164   :  { %3153 = vmatprep.subr.bf16.mxu1 %v3890_v54 }
 0x166   :  { %3111 = vmatpush1.bf16.msra.mxu0 %v3791_v35 }
 0x167   :  { %3113 = vmatprep.subr.bf16.mxu0 %v3795_v36  ;;  %3155 = vmatpush1.bf16.msra.mxu1 %v3893_v59 }
 0x168   :  { %3189 = vmatprep.subr.bf16.mxu1 %v3831_v56 }
 0x16a   :  { %3115 = vmatpush1.bf16.msra.mxu0 %v3798_v41 }
 0x16b   :  { %3117 = vmatprep.subr.bf16.mxu0 %v3806_v43 }
 0x16e   :  { %3119 = vmatpush1.bf16.msra.mxu0 %v3815_v49 }
 0x16f   :  { %3121 = vmatprep.subr.bf16.mxu0 %v3820_v50 }
 0x172   :  { %3123 = vmatpush1.bf16.msra.mxu0 %v3827_v55 }
 0x173   :  { %2836 = vmatprep.subr.msk.mxu0 %vm255_vm0, %v3774_v27 }
 0x21c   :  { %v574_v3 = vpop.f32.mrb[4].mxu1 }
 0x21d   :  { %v576_v7 = vpop.f32.mrb[5].mxu1 }
 0x224   :  { %v648_v10 = vpop.f32.mrb[4].mxu0 }
 0x225   :  { %v2832_v11 = vmul.f32 -1.442695, %v648_v10  ;;  %v650_v12 = vpop.f32.mrb[5].mxu0 }
 0x226   :  { %v2833_v17 = vmul.f32 -1.442695, %v650_v12 }
 0x227   :  { %3562 = vpow2.f32 %v2832_v11 }
 0x228   :  { %3564 = vpow2.f32 %v2833_v17  ;;  %v719_v18 = vpop.f32.mrb[6].mxu0 }
 0x229   :  { %v720_v19 = vadd.f32 %v719_v18, %v574_v3  ;;  %v721_v22 = vpop.f32.mrb[7].mxu0 }
 0x22a   :  { %v722_v25 = vadd.f32 %v721_v22, %v576_v7 }
 0x22c   :  { %v2834_v29 = vmul.f32 -1.442695, %v722_v25 }
 0x22e   :  { %3566 = vpow2.f32 %v2834_v29 }
 0x22f   :  { %3568 = vtanh.f32 %v720_v19 }
 0x231   :  { %v3563_v31 = vpop.eup %3562 }
 0x232   :  { %v3565_v32 = vpop.eup %3564  ;;  %v727_v37 = vadd.f32 1.0, %v3563_v31 }
 0x233   :  { %v733_v38 = vadd.f32 1.0, %v3565_v32 }
 0x234   :  { %3570 = vrcp.f32 %v727_v37 }
 0x235   :  { %3572 = vrcp.f32 %v733_v38 }
 0x238   :  { %v3567_v39 = vpop.eup %3566 }
 0x239   :  { %v3569_v40 = vpop.eup %3568  ;;  %v740_v52 = vadd.f32 1.0, %v3567_v39 }
 0x23b   :  { %3574 = vrcp.f32 %v740_v52 }
 0x23e   :  { %v3571_v47 = vpop.eup %3570 }
 0x23f   :  { %v3573_v48 = vpop.eup %3572  ;;  %v744_v51 = vmul.f32 %v3571_v47, %v3569_v40 }
 0x240   :  { %v743_v58 = vmul.f32 %v3573_v48, %v3916_v57  ;;  %v2835_v57 = vld [vmem:[%s4373_s0 + $0x10] sm:$0xff] }
 0x242   :  { %v3973_v60 = vadd.f32 %v744_v51, %v743_v58 }
 0x244   :  { %3576 = vtanh.f32 %v3973_v60 }
 0x245   :  { %v3575_v63 = vpop.eup %3574 }
 0x24e   :  { %v3577_v2 = vpop.eup %3576 }
 0x24f   :  { %v3976_v3 = vmul.f32 %v3577_v2, %v3575_v63 }
 0x251   :  { %821 = vmatmul.mubr.f32.vlgmr.msra.gmra.mrb[8].mxu0 %v3976_v3  ;;  %892 = vmatmul.mubr.f32.vlgmr.msra.gmra.mrb[6].mxu1 %v3976_v3 }
 0x252   :  { %2837 = vmatpush1.msk.msra.mxu0 %vm255_vm0, %v3770_v26  ;;  %965 = vmatprep.mubr.f32.mxu0 %v3703_v0 }
 0x253   :  { %2839 = vmatprep.subr.msk.mxu0 %vm255_vm0, %v3810_v46  ;;  %3191 = vmatpush1.bf16.msra.mxu1 %v3835_v61 }
 0x254   :  { %3193 = vmatprep.subr.bf16.mxu1 %v3839_v62  ;;  %1210 = vmatprep.mubr.f32.mxu1 %v3703_v0 }
 0x257   :  { %3195 = vmatpush1.bf16.msra.mxu1 %v3844_v5 }
 0x258   :  { %3197 = vmatprep.subr.bf16.mxu1 %v3848_v6 }
 0x259   :  { %2838 = vmatmul.mubr.msk.f32.vlgmr.msra.gmra.mrb[8].mxu0 %vm251_vm1, %v2835_v57 }
 0x25a   :  { %2840 = vmatpush1.msk.msra.mxu0 %vm255_vm0, %v3803_v42  ;;  %1036 = vmatprep.mubr.f32.mxu0 %v3703_v0 }
 0x25b   :  { %3157 = vmatprep.subr.bf16.mxu0 %v3748_v4  ;;  %3199 = vmatpush1.bf16.msra.mxu1 %v3853_v13 }
 0x25c   :  { %3201 = vmatprep.subr.bf16.mxu1 %v3857_v16 }
 0x25d   :  { %2841 = vmatmul.mubr.msk.f32.vlgmr.msra.gmra.mrb[10].mxu0 %vm251_vm1, %v2835_v57 }
 0x25e   :  { %3159 = vmatpush1.bf16.msra.mxu0 %v3750_v8  ;;  %1139 = vmatprep.mubr.f32.mxu0 %v3703_v0 }
 0x25f   :  { %3161 = vmatprep.subr.bf16.mxu0 %v3752_v9  ;;  %3203 = vmatpush1.bf16.msra.mxu1 %v3861_v23 }
 0x260   :  { %3205 = vmatprep.subr.bf16.mxu1 %v3865_v24 }
 0x262   :  { %3163 = vmatpush1.bf16.msra.mxu0 %v3756_v14 }
 0x263   :  { %3165 = vmatprep.subr.bf16.mxu0 %v3759_v15  ;;  %3207 = vmatpush1.bf16.msra.mxu1 %v3869_v33 }
 0x264   :  { %3209 = vmatprep.subr.bf16.mxu1 %v3873_v34 }
 0x266   :  { %3167 = vmatpush1.bf16.msra.mxu0 %v3762_v20 }
 0x267   :  { %3169 = vmatprep.subr.bf16.mxu0 %v3765_v21  ;;  %3211 = vmatpush1.bf16.msra.mxu1 %v3877_v44 }
 0x268   :  { %3213 = vmatprep.subr.bf16.mxu1 %v3881_v45 }
 0x26a   :  { %3171 = vmatpush1.bf16.msra.mxu0 %v3777_v28 }
 0x26b   :  { %3173 = vmatprep.subr.bf16.mxu0 %v3783_v30  ;;  %3215 = vmatpush1.bf16.msra.mxu1 %v3885_v53 }
 0x26c   :  { %3217 = vmatprep.subr.bf16.mxu1 %v3890_v54 }
 0x26e   :  { %3175 = vmatpush1.bf16.msra.mxu0 %v3791_v35 }
 0x26f   :  { %3177 = vmatprep.subr.bf16.mxu0 %v3795_v36  ;;  %3219 = vmatpush1.bf16.msra.mxu1 %v3893_v59 }
 0x270   :  { %2849 = vmatprep.subr.msk.mxu1 %vm255_vm0, %v3810_v46 }
 0x272   :  { %3179 = vmatpush1.bf16.msra.mxu0 %v3798_v41 }
 0x273   :  { %3181 = vmatprep.subr.bf16.mxu0 %v3806_v43 }
 0x276   :  { %3183 = vmatpush1.bf16.msra.mxu0 %v3815_v49 }
 0x277   :  { %3185 = vmatprep.subr.bf16.mxu0 %v3820_v50 }
 0x27a   :  { %3187 = vmatpush1.bf16.msra.mxu0 %v3827_v55 }
 0x27b   :  { %2846 = vmatprep.subr.msk.mxu0 %vm255_vm0, %v3774_v27 }
 0x324   :  { %v893_v7 = vpop.f32.mrb[6].mxu1 }
 0x325   :  { %v895_v10 = vpop.f32.mrb[7].mxu1 }
 0x32c   :  { %v967_v11 = vpop.f32.mrb[8].mxu0 }
 0x32d   :  { %v2842_v12 = vmul.f32 -1.442695, %v967_v11  ;;  %v969_v17 = vpop.f32.mrb[9].mxu0 }
 0x32e   :  { %v2843_v18 = vmul.f32 -1.442695, %v969_v17 }
 0x32f   :  { %3578 = vpow2.f32 %v2842_v12 }
 0x330   :  { %3580 = vpow2.f32 %v2843_v18  ;;  %v1038_v19 = vpop.f32.mrb[10].mxu0 }
 0x331   :  { %v1039_v22 = vadd.f32 %v1038_v19, %v893_v7  ;;  %v1040_v25 = vpop.f32.mrb[11].mxu0 }
 0x332   :  { %v1041_v29 = vadd.f32 %v1040_v25, %v895_v10 }
 0x334   :  { %v2844_v31 = vmul.f32 -1.442695, %v1041_v29 }
 0x336   :  { %3582 = vpow2.f32 %v2844_v31 }
 0x337   :  { %3584 = vtanh.f32 %v1039_v22 }
 0x339   :  { %v3579_v32 = vpop.eup %3578 }
 0x33a   :  { %v3581_v37 = vpop.eup %3580  ;;  %v1046_v38 = vadd.f32 1.0, %v3579_v32 }
 0x33b   :  { %v1052_v39 = vadd.f32 1.0, %v3581_v37 }
 0x33c   :  { %3586 = vrcp.f32 %v1046_v38 }
 0x33d   :  { %3588 = vrcp.f32 %v1052_v39 }
 0x340   :  { %v3583_v40 = vpop.eup %3582 }
 0x341   :  { %v3585_v47 = vpop.eup %3584  ;;  %v1059_v58 = vadd.f32 1.0, %v3583_v40 }
 0x343   :  { %3590 = vrcp.f32 %v1059_v58 }
 0x346   :  { %v3587_v48 = vpop.eup %3586 }
 0x347   :  { %v3589_v51 = vpop.eup %3588  ;;  %v1063_v52 = vmul.f32 %v3587_v48, %v3585_v47 }
 0x348   :  { %v1062_v63 = vmul.f32 %v3589_v51, %v3973_v60  ;;  %v2845_v60 = vld [vmem:[%s4373_s0 + $0x18] sm:$0xff] }
 0x34a   :  { %v4031_v2 = vadd.f32 %v1063_v52, %v1062_v63 }
 0x34c   :  { %3592 = vtanh.f32 %v4031_v2 }
 0x34d   :  { %v3591_v57 = vpop.eup %3590 }
 0x356   :  { %v3593_v7 = vpop.eup %3592 }
 0x357   :  { %v4034_v10 = vmul.f32 %v3593_v7, %v3591_v57 }
 0x359   :  { %1140 = vmatmul.mubr.f32.vlgmr.msra.gmra.mrb[12].mxu0 %v4034_v10  ;;  %1211 = vmatmul.mubr.f32.vlgmr.msra.gmra.mrb[8].mxu1 %v4034_v10 }
 0x35a   :  { %2847 = vmatpush1.msk.msra.mxu0 %vm255_vm0, %v3770_v26  ;;  %1284 = vmatprep.mubr.f32.mxu0 %v3703_v0 }
 0x35b   :  { %2850 = vmatpush1.msk.msra.mxu1 %vm255_vm0, %v3803_v42  ;;  %1355 = vmatprep.mubr.f32.mxu1 %v3703_v0 }
 0x35c   :  { %3221 = vmatprep.subr.bf16.mxu0 %v3748_v4  ;;  %3253 = vmatprep.subr.bf16.mxu1 %v3831_v56 }
 0x361   :  { %2848 = vmatmul.mubr.msk.f32.vlgmr.msra.gmra.mrb[12].mxu0 %vm251_vm1, %v2845_v60  ;;  %2851 = vmatmul.mubr.msk.f32.vlgmr.msra.gmra.mrb[8].mxu1 %vm251_vm1, %v2845_v60 }
 0x362   :  { %3223 = vmatpush1.bf16.msra.mxu0 %v3750_v8  ;;  %3255 = vmatpush1.bf16.msra.mxu1 %v3835_v61 }
 0x363   :  { %3225 = vmatprep.subr.bf16.mxu0 %v3752_v9  ;;  %3257 = vmatprep.subr.bf16.mxu1 %v3839_v62 }
 0x364   :  { %1458 = vmatprep.mubr.f32.mxu0 %v3703_v0  ;;  %1529 = vmatprep.mubr.f32.mxu1 %v3703_v0 }
 0x366   :  { %3227 = vmatpush1.bf16.msra.mxu0 %v3756_v14  ;;  %3259 = vmatpush1.bf16.msra.mxu1 %v3844_v5 }
 0x367   :  { %3229 = vmatprep.subr.bf16.mxu0 %v3759_v15  ;;  %3261 = vmatprep.subr.bf16.mxu1 %v3848_v6 }
 0x36a   :  { %3231 = vmatpush1.bf16.msra.mxu0 %v3762_v20  ;;  %3263 = vmatpush1.bf16.msra.mxu1 %v3853_v13 }
 0x36b   :  { %3233 = vmatprep.subr.bf16.mxu0 %v3765_v21  ;;  %3265 = vmatprep.subr.bf16.mxu1 %v3857_v16 }
 0x36e   :  { %3235 = vmatpush1.bf16.msra.mxu0 %v3777_v28  ;;  %3267 = vmatpush1.bf16.msra.mxu1 %v3861_v23 }
 0x36f   :  { %3237 = vmatprep.subr.bf16.mxu0 %v3783_v30  ;;  %3269 = vmatprep.subr.bf16.mxu1 %v3865_v24 }
 0x372   :  { %3239 = vmatpush1.bf16.msra.mxu0 %v3791_v35  ;;  %3271 = vmatpush1.bf16.msra.mxu1 %v3869_v33 }
 0x373   :  { %3241 = vmatprep.subr.bf16.mxu0 %v3795_v36  ;;  %3273 = vmatprep.subr.bf16.mxu1 %v3873_v34 }
 0x376   :  { %3243 = vmatpush1.bf16.msra.mxu0 %v3798_v41  ;;  %3275 = vmatpush1.bf16.msra.mxu1 %v3877_v44 }
 0x377   :  { %3245 = vmatprep.subr.bf16.mxu0 %v3806_v43  ;;  %3277 = vmatprep.subr.bf16.mxu1 %v3881_v45 }
 0x37a   :  { %3247 = vmatpush1.bf16.msra.mxu0 %v3815_v49  ;;  %3279 = vmatpush1.bf16.msra.mxu1 %v3885_v53 }
 0x37b   :  { %3249 = vmatprep.subr.bf16.mxu0 %v3820_v50  ;;  %3281 = vmatprep.subr.bf16.mxu1 %v3890_v54 }
 0x37e   :  { %3251 = vmatpush1.bf16.msra.mxu0 %v3827_v55  ;;  %3283 = vmatpush1.bf16.msra.mxu1 %v3893_v59 }
 0x37f   :  { %2856 = vmatprep.subr.msk.mxu0 %vm255_vm0, %v3774_v27  ;;  %2859 = vmatprep.subr.msk.mxu1 %vm255_vm0, %v3810_v46 }
 0x434   :  { %v1286_v11 = vpop.f32.mrb[12].mxu0  ;;  %v1357_v12 = vpop.f32.mrb[8].mxu1 }
 0x435   :  { %v2852_v17 = vmul.f32 -1.442695, %v1286_v11  ;;  %v1288_v18 = vpop.f32.mrb[13].mxu0  ;;  %v1359_v19 = vpop.f32.mrb[9].mxu1 }
 0x436   :  { %v2853_v22 = vmul.f32 -1.442695, %v1288_v18  ;;  %v2854_v25 = vmul.f32 -1.442695, %v1359_v19 }
 0x437   :  { %3594 = vpow2.f32 %v2852_v17 }
 0x438   :  { %3596 = vpow2.f32 %v2853_v22 }
 0x439   :  { %3598 = vpow2.f32 %v2854_v25 }
 0x43a   :  { %3600 = vtanh.f32 %v1357_v12 }
 0x441   :  { %v3595_v29 = vpop.eup %3594 }
 0x442   :  { %v3597_v31 = vpop.eup %3596  ;;  %v1365_v32 = vadd.f32 1.0, %v3595_v29 }
 0x443   :  { %v1371_v37 = vadd.f32 1.0, %v3597_v31  ;;  %v3599_v38 = vpop.eup %3598 }
 0x444   :  { %3602 = vrcp.f32 %v1365_v32  ;;  %v3601_v39 = vpop.eup %3600  ;;  %v1378_v51 = vadd.f32 1.0, %v3599_v38 }
 0x445   :  { %3604 = vrcp.f32 %v1371_v37 }
 0x446   :  { %3606 = vrcp.f32 %v1378_v51 }
 0x44e   :  { %v3603_v40 = vpop.eup %3602 }
 0x44f   :  { %v3605_v47 = vpop.eup %3604  ;;  %v1382_v48 = vmul.f32 %v3603_v40, %v3601_v39 }
 0x450   :  { %v1381_v52 = vmul.f32 %v3605_v47, %v4031_v2  ;;  %v3607_v63 = vpop.eup %3606  ;;  %v2855_v2 = vld [vmem:[%s4373_s0 + $0x20] sm:$0xff] }
 0x452   :  { %v4088_v58 = vadd.f32 %v1382_v48, %v1381_v52 }
 0x454   :  { %3608 = vtanh.f32 %v4088_v58 }
 0x45e   :  { %v3609_v57 = vpop.eup %3608 }
 0x45f   :  { %v4091_v7 = vmul.f32 %v3609_v57, %v3607_v63 }
 0x461   :  { %1459 = vmatmul.mubr.f32.vlgmr.msra.gmra.mrb[14].mxu0 %v4091_v7  ;;  %1530 = vmatmul.mubr.f32.vlgmr.msra.gmra.mrb[10].mxu1 %v4091_v7 }
 0x462   :  { %2857 = vmatpush1.msk.msra.mxu0 %vm255_vm0, %v3770_v26  ;;  %1603 = vmatprep.mubr.f32.mxu0 %v3703_v0 }
 0x463   :  { %2860 = vmatpush1.msk.msra.mxu1 %vm255_vm0, %v3803_v42  ;;  %1674 = vmatprep.mubr.f32.mxu1 %v3703_v0 }
 0x464   :  { %3285 = vmatprep.subr.bf16.mxu0 %v3748_v4  ;;  %3317 = vmatprep.subr.bf16.mxu1 %v3831_v56 }
 0x469   :  { %2858 = vmatmul.mubr.msk.f32.vlgmr.msra.gmra.mrb[14].mxu0 %vm251_vm1, %v2855_v2  ;;  %2861 = vmatmul.mubr.msk.f32.vlgmr.msra.gmra.mrb[10].mxu1 %vm251_vm1, %v2855_v2 }
 0x46a   :  { %3287 = vmatpush1.bf16.msra.mxu0 %v3750_v8  ;;  %3319 = vmatpush1.bf16.msra.mxu1 %v3835_v61 }
 0x46b   :  { %3289 = vmatprep.subr.bf16.mxu0 %v3752_v9  ;;  %3321 = vmatprep.subr.bf16.mxu1 %v3839_v62 }
 0x46c   :  { %1777 = vmatprep.mubr.f32.mxu0 %v3703_v0  ;;  %1848 = vmatprep.mubr.f32.mxu1 %v3703_v0 }
 0x46e   :  { %3291 = vmatpush1.bf16.msra.mxu0 %v3756_v14  ;;  %3323 = vmatpush1.bf16.msra.mxu1 %v3844_v5 }
 0x46f   :  { %3293 = vmatprep.subr.bf16.mxu0 %v3759_v15  ;;  %3325 = vmatprep.subr.bf16.mxu1 %v3848_v6 }
 0x472   :  { %3295 = vmatpush1.bf16.msra.mxu0 %v3762_v20  ;;  %3327 = vmatpush1.bf16.msra.mxu1 %v3853_v13 }
 0x473   :  { %3297 = vmatprep.subr.bf16.mxu0 %v3765_v21  ;;  %3329 = vmatprep.subr.bf16.mxu1 %v3857_v16 }
 0x476   :  { %3299 = vmatpush1.bf16.msra.mxu0 %v3777_v28  ;;  %3331 = vmatpush1.bf16.msra.mxu1 %v3861_v23 }
 0x477   :  { %3301 = vmatprep.subr.bf16.mxu0 %v3783_v30  ;;  %3333 = vmatprep.subr.bf16.mxu1 %v3865_v24 }
 0x47a   :  { %3303 = vmatpush1.bf16.msra.mxu0 %v3791_v35  ;;  %3335 = vmatpush1.bf16.msra.mxu1 %v3869_v33 }
 0x47b   :  { %3305 = vmatprep.subr.bf16.mxu0 %v3795_v36  ;;  %3337 = vmatprep.subr.bf16.mxu1 %v3873_v34 }
 0x47e   :  { %3307 = vmatpush1.bf16.msra.mxu0 %v3798_v41  ;;  %3339 = vmatpush1.bf16.msra.mxu1 %v3877_v44 }
 0x47f   :  { %3309 = vmatprep.subr.bf16.mxu0 %v3806_v43  ;;  %3341 = vmatprep.subr.bf16.mxu1 %v3881_v45 }
 0x482   :  { %3311 = vmatpush1.bf16.msra.mxu0 %v3815_v49  ;;  %3343 = vmatpush1.bf16.msra.mxu1 %v3885_v53 }
 0x483   :  { %3313 = vmatprep.subr.bf16.mxu0 %v3820_v50  ;;  %3345 = vmatprep.subr.bf16.mxu1 %v3890_v54 }
 0x486   :  { %3315 = vmatpush1.bf16.msra.mxu0 %v3827_v55  ;;  %3347 = vmatpush1.bf16.msra.mxu1 %v3893_v59 }
 0x487   :  { %2866 = vmatprep.subr.msk.mxu0 %vm255_vm0, %v3774_v27  ;;  %2869 = vmatprep.subr.msk.mxu1 %vm255_vm0, %v3810_v46 }
 0x53c   :  { %v1605_v60 = vpop.f32.mrb[14].mxu0  ;;  %v1676_v11 = vpop.f32.mrb[10].mxu1 }
 0x53d   :  { %v2862_v12 = vmul.f32 -1.442695, %v1605_v60  ;;  %v1607_v17 = vpop.f32.mrb[15].mxu0  ;;  %v1678_v18 = vpop.f32.mrb[11].mxu1 }
 0x53e   :  { %v2863_v19 = vmul.f32 -1.442695, %v1607_v17  ;;  %v2864_v22 = vmul.f32 -1.442695, %v1678_v18 }
 0x53f   :  { %3610 = vpow2.f32 %v2862_v12 }
 0x540   :  { %3612 = vpow2.f32 %v2863_v19 }
 0x541   :  { %3614 = vpow2.f32 %v2864_v22 }
 0x542   :  { %3616 = vtanh.f32 %v1676_v11 }
 0x549   :  { %v3611_v25 = vpop.eup %3610 }
 0x54a   :  { %v3613_v29 = vpop.eup %3612  ;;  %v1684_v31 = vadd.f32 1.0, %v3611_v25 }
 0x54b   :  { %v1690_v32 = vadd.f32 1.0, %v3613_v29  ;;  %v3615_v37 = vpop.eup %3614 }
 0x54c   :  { %3618 = vrcp.f32 %v1684_v31  ;;  %v3617_v38 = vpop.eup %3616  ;;  %v1697_v48 = vadd.f32 1.0, %v3615_v37 }
 0x54d   :  { %3620 = vrcp.f32 %v1690_v32 }
 0x54e   :  { %3622 = vrcp.f32 %v1697_v48 }
 0x556   :  { %v3619_v39 = vpop.eup %3618 }
 0x557   :  { %v3621_v40 = vpop.eup %3620  ;;  %v1701_v47 = vmul.f32 %v3619_v39, %v3617_v38 }
 0x558   :  { %v1700_v51 = vmul.f32 %v3621_v40, %v4088_v58  ;;  %v3623_v63 = vpop.eup %3622  ;;  %v2865_v58 = vld [vmem:[%s4373_s0 + $0x28] sm:$0xff] }
 0x55a   :  { %v4145_v52 = vadd.f32 %v1701_v47, %v1700_v51 }
 0x55c   :  { %3624 = vtanh.f32 %v4145_v52 }
 0x566   :  { %v3625_v57 = vpop.eup %3624 }
 0x567   :  { %v4148_v2 = vmul.f32 %v3625_v57, %v3623_v63 }
 0x569   :  { %1778 = vmatmul.mubr.f32.vlgmr.msra.gmra.mrb[16].mxu0 %v4148_v2  ;;  %1849 = vmatmul.mubr.f32.vlgmr.msra.gmra.mrb[12].mxu1 %v4148_v2 }
 0x56a   :  { %2867 = vmatpush1.msk.msra.mxu0 %vm255_vm0, %v3770_v26  ;;  %1922 = vmatprep.mubr.f32.mxu0 %v3703_v0 }
 0x56b   :  { %2870 = vmatpush1.msk.msra.mxu1 %vm255_vm0, %v3803_v42  ;;  %1993 = vmatprep.mubr.f32.mxu1 %v3703_v0 }
 0x56c   :  { %3349 = vmatprep.subr.bf16.mxu0 %v3748_v4  ;;  %3381 = vmatprep.subr.bf16.mxu1 %v3831_v56 }
 0x571   :  { %2868 = vmatmul.mubr.msk.f32.vlgmr.msra.gmra.mrb[16].mxu0 %vm251_vm1, %v2865_v58  ;;  %2871 = vmatmul.mubr.msk.f32.vlgmr.msra.gmra.mrb[12].mxu1 %vm251_vm1, %v2865_v58  ;;  %v4212_v58 = vld [vmem:[%s4374_s1] sm:$0xff] }
 0x572   :  { %3351 = vmatpush1.bf16.msra.mxu0 %v3750_v8  ;;  %3383 = vmatpush1.bf16.msra.mxu1 %v3835_v61 }
 0x573   :  { %3353 = vmatprep.subr.bf16.mxu0 %v3752_v9  ;;  %3385 = vmatprep.subr.bf16.mxu1 %v3839_v62 }
 0x574   :  { %2096 = vmatprep.mubr.f32.mxu0 %v3703_v0  ;;  %2167 = vmatprep.mubr.f32.mxu1 %v3703_v0 }
 0x576   :  { %3355 = vmatpush1.bf16.msra.mxu0 %v3756_v14  ;;  %3387 = vmatpush1.bf16.msra.mxu1 %v3844_v5 }
 0x577   :  { %3357 = vmatprep.subr.bf16.mxu0 %v3759_v15  ;;  %3389 = vmatprep.subr.bf16.mxu1 %v3848_v6 }
 0x57a   :  { %3359 = vmatpush1.bf16.msra.mxu0 %v3762_v20  ;;  %3391 = vmatpush1.bf16.msra.mxu1 %v3853_v13 }
 0x57b   :  { %3361 = vmatprep.subr.bf16.mxu0 %v3765_v21  ;;  %3393 = vmatprep.subr.bf16.mxu1 %v3857_v16 }
 0x57e   :  { %3363 = vmatpush1.bf16.msra.mxu0 %v3777_v28  ;;  %3395 = vmatpush1.bf16.msra.mxu1 %v3861_v23 }
 0x57f   :  { %3365 = vmatprep.subr.bf16.mxu0 %v3783_v30  ;;  %3397 = vmatprep.subr.bf16.mxu1 %v3865_v24 }
 0x582   :  { %3367 = vmatpush1.bf16.msra.mxu0 %v3791_v35  ;;  %3399 = vmatpush1.bf16.msra.mxu1 %v3869_v33 }
 0x583   :  { %3369 = vmatprep.subr.bf16.mxu0 %v3795_v36  ;;  %3401 = vmatprep.subr.bf16.mxu1 %v3873_v34 }
 0x586   :  { %3371 = vmatpush1.bf16.msra.mxu0 %v3798_v41  ;;  %3403 = vmatpush1.bf16.msra.mxu1 %v3877_v44 }
 0x587   :  { %3373 = vmatprep.subr.bf16.mxu0 %v3806_v43  ;;  %3405 = vmatprep.subr.bf16.mxu1 %v3881_v45 }
 0x58a   :  { %3375 = vmatpush1.bf16.msra.mxu0 %v3815_v49  ;;  %3407 = vmatpush1.bf16.msra.mxu1 %v3885_v53 }
 0x58b   :  { %3377 = vmatprep.subr.bf16.mxu0 %v3820_v50  ;;  %3409 = vmatprep.subr.bf16.mxu1 %v3890_v54 }
 0x58e   :  { %3379 = vmatpush1.bf16.msra.mxu0 %v3827_v55  ;;  %3411 = vmatpush1.bf16.msra.mxu1 %v3893_v59 }
 0x58f   :  { %2876 = vmatprep.subr.msk.mxu0 %vm255_vm0, %v3774_v27  ;;  %2879 = vmatprep.subr.msk.mxu1 %vm255_vm0, %v3810_v46 }
 0x644   :  { %v1924_v26 = vpop.f32.mrb[16].mxu0  ;;  %v1995_v42 = vpop.f32.mrb[12].mxu1 }
 0x645   :  { %v2872_v60 = vmul.f32 -1.442695, %v1924_v26  ;;  %v1926_v11 = vpop.f32.mrb[17].mxu0  ;;  %v1997_v12 = vpop.f32.mrb[13].mxu1  ;;  %v2875_v26 = vld [vmem:[%s4373_s0 + $0x30] sm:$0xff] }
 0x646   :  { %v2873_v17 = vmul.f32 -1.442695, %v1926_v11  ;;  %v2874_v18 = vmul.f32 -1.442695, %v1997_v12  ;;  %v2684_v11 = vld [vmem:[%s4376_s3 + $0x50] sm:$0xff]  ;;  %v2685_v12 = vld [vmem:[%s4376_s3 + $0x58] sm:$0xff] }
 0x647   :  { %3626 = vpow2.f32 %v2872_v60 }
 0x648   :  { %3628 = vpow2.f32 %v2873_v17  ;;  %v3496_v17 = vpack.c.bf16 %v2685_v12, %v2684_v11 }
 0x649   :  { %3630 = vpow2.f32 %v2874_v18  ;;  %v2686_v18 = vld [vmem:[%s4376_s3 + $0x60] sm:$0xff] }
 0x64a   :  { %3632 = vtanh.f32 %v1995_v42  ;;  %v2682_v42 = vld [vmem:[%s4376_s3 + $0x40] sm:$0xff] }
 0x651   :  { %v3627_v19 = vpop.eup %3626 }
 0x652   :  { %v3629_v22 = vpop.eup %3628  ;;  %v2003_v25 = vadd.f32 1.0, %v3627_v19  ;;  %v2687_v19 = vld [vmem:[%s4376_s3 + $0x68] sm:$0xff] }
 0x653   :  { %v2009_v29 = vadd.f32 1.0, %v3629_v22  ;;  %v3631_v31 = vpop.eup %3630  ;;  %v3500_v22 = vpack.c.bf16 %v2687_v19, %v2686_v18 }
 0x654   :  { %3634 = vrcp.f32 %v2003_v25  ;;  %v3633_v32 = vpop.eup %3632  ;;  %v2016_v40 = vadd.f32 1.0, %v3631_v31  ;;  %v2688_v25 = vld [vmem:[%s4376_s3 + $0x70] sm:$0xff] }
 0x655   :  { %3636 = vrcp.f32 %v2009_v29  ;;  %v2689_v29 = vld [vmem:[%s4376_s3 + $0x78] sm:$0xff] }
 0x656   :  { %3638 = vrcp.f32 %v2016_v40  ;;  %v3504_v31 = vpack.c.bf16 %v2689_v29, %v2688_v25 }
 0x65e   :  { %v3635_v37 = vpop.eup %3634 }
 0x65f   :  { %v3637_v38 = vpop.eup %3636  ;;  %v2020_v39 = vmul.f32 %v3635_v37, %v3633_v32 }
 0x660   :  { %v2019_v47 = vmul.f32 %v3637_v38, %v4145_v52  ;;  %v3639_v51 = vpop.eup %3638  ;;  %v4220_v52 = vld [vmem:[%s4374_s1 + $0x8] sm:$0xff] }
 0x662   :  { %v4202_v48 = vadd.f32 %v2020_v39, %v2019_v47 }
 0x664   :  { %3640 = vtanh.f32 %v4202_v48 }
 0x66e   :  { %v3641_v63 = vpop.eup %3640 }
 0x66f   :  { %v4205_v57 = vmul.f32 %v3641_v63, %v3639_v51 }
 0x671   :  { %2097 = vmatmul.mubr.f32.vlgmr.msra.gmra.mrb[18].mxu0 %v4205_v57  ;;  %2168 = vmatmul.mubr.f32.vlgmr.msra.gmra.mrb[14].mxu1 %v4205_v57 }
 0x672   :  { %2877 = vmatpush1.msk.msra.mxu0 %vm255_vm0, %v4212_v58  ;;  %2241 = vmatprep.mubr.f32.mxu0 %v3703_v0 }
 0x673   :  { %2880 = vmatpush1.msk.msra.mxu1 %vm255_vm0, %v4220_v52  ;;  %2312 = vmatprep.mubr.f32.mxu1 %v3703_v0 }
 0x674   :  { %3413 = vmatprep.subr.bf16.mxu0 %v3748_v4  ;;  %3445 = vmatprep.subr.bf16.mxu1 %v3831_v56 }
 0x679   :  { %2878 = vmatmul.mubr.msk.f32.vlgmr.msra.gmra.mrb[18].mxu0 %vm251_vm1, %v2875_v26  ;;  %2881 = vmatmul.mubr.msk.f32.vlgmr.msra.gmra.mrb[14].mxu1 %vm251_vm1, %v2875_v26 }
 0x67a   :  { %3415 = vmatpush1.bf16.msra.mxu0 %v3750_v8  ;;  %3447 = vmatpush1.bf16.msra.mxu1 %v3835_v61 }
 0x67b   :  { %3417 = vmatprep.subr.bf16.mxu0 %v3752_v9  ;;  %3449 = vmatprep.subr.bf16.mxu1 %v3839_v62  ;;  %v2674_v62 = vld [vmem:[%s4376_s3] sm:$0xff] }
 0x67c   :  { %2415 = vmatprep.mubr.f32.mxu0 %v3703_v0  ;;  %2486 = vmatprep.mubr.f32.mxu1 %v3703_v0 }
 0x67e   :  { %3419 = vmatpush1.bf16.msra.mxu0 %v3756_v14  ;;  %3451 = vmatpush1.bf16.msra.mxu1 %v3844_v5  ;;  %v2675_v5 = vld [vmem:[%s4376_s3 + $0x8] sm:$0xff] }
 0x67f   :  { %3421 = vmatprep.subr.bf16.mxu0 %v3759_v15  ;;  %3453 = vmatprep.subr.bf16.mxu1 %v3848_v6 }
 0x682   :  { %3423 = vmatpush1.bf16.msra.mxu0 %v3762_v20  ;;  %3455 = vmatpush1.bf16.msra.mxu1 %v3853_v13 }
 0x683   :  { %3425 = vmatprep.subr.bf16.mxu0 %v3765_v21  ;;  %3457 = vmatprep.subr.bf16.mxu1 %v3857_v16  ;;  %v3476_v16 = vpack.c.bf16 %v2675_v5, %v2674_v62 }
 0x686   :  { %3427 = vmatpush1.bf16.msra.mxu0 %v3777_v28  ;;  %3459 = vmatpush1.bf16.msra.mxu1 %v3861_v23  ;;  %v2676_v23 = vld [vmem:[%s4376_s3 + $0x10] sm:$0xff] }
 0x687   :  { %3429 = vmatprep.subr.bf16.mxu0 %v3783_v30  ;;  %3461 = vmatprep.subr.bf16.mxu1 %v3865_v24  ;;  %v2677_v24 = vld [vmem:[%s4376_s3 + $0x18] sm:$0xff] }
 0x68a   :  { %3431 = vmatpush1.bf16.msra.mxu0 %v3791_v35  ;;  %3463 = vmatpush1.bf16.msra.mxu1 %v3869_v33  ;;  %v2885_v33 = vld [vmem:[%s4373_s0 + $0x38] sm:$0xff] }
 0x68b   :  { %3433 = vmatprep.subr.bf16.mxu0 %v3795_v36  ;;  %3465 = vmatprep.subr.bf16.mxu1 %v3873_v34  ;;  %v3480_v34 = vpack.c.bf16 %v2677_v24, %v2676_v23 }
 0x68e   :  { %3435 = vmatpush1.bf16.msra.mxu0 %v3798_v41  ;;  %3467 = vmatpush1.bf16.msra.mxu1 %v3877_v44  ;;  %v2678_v44 = vld [vmem:[%s4376_s3 + $0x20] sm:$0xff] }
 0x68f   :  { %3437 = vmatprep.subr.bf16.mxu0 %v3806_v43  ;;  %3469 = vmatprep.subr.bf16.mxu1 %v3881_v45 }
 0x692   :  { %3439 = vmatpush1.bf16.msra.mxu0 %v3815_v49  ;;  %3471 = vmatpush1.bf16.msra.mxu1 %v3885_v53  ;;  %v2680_v53 = vld [vmem:[%s4376_s3 + $0x30] sm:$0xff] }
 0x693   :  { %3441 = vmatprep.subr.bf16.mxu0 %v3820_v50  ;;  %3473 = vmatprep.subr.bf16.mxu1 %v3890_v54  ;;  %v2681_v54 = vld [vmem:[%s4376_s3 + $0x38] sm:$0xff] }
 0x696   :  { %3443 = vmatpush1.bf16.msra.mxu0 %v3827_v55  ;;  %3475 = vmatpush1.bf16.msra.mxu1 %v3893_v59  ;;  %v3488_v59 = vpack.c.bf16 %v2681_v54, %v2680_v53 }
 0x697   :  { %2886 = vmatprep.subr.msk.mxu0 %vm255_vm0, %v3774_v27  ;;  %2889 = vmatprep.subr.msk.mxu1 %vm255_vm0, %v3810_v46 }
 0x74c   :  { %v2243_v4 = vpop.f32.mrb[18].mxu0  ;;  %v2314_v8 = vpop.f32.mrb[14].mxu1 }
 0x74d   :  { %v2882_v9 = vmul.f32 -1.442695, %v2243_v4  ;;  %v2245_v14 = vpop.f32.mrb[19].mxu0  ;;  %v2316_v15 = vpop.f32.mrb[15].mxu1 }
 0x74e   :  { %v2883_v20 = vmul.f32 -1.442695, %v2245_v14  ;;  %v2884_v21 = vmul.f32 -1.442695, %v2316_v15 }
 0x74f   :  { %3642 = vpow2.f32 %v2882_v9 }
 0x750   :  { %3644 = vpow2.f32 %v2883_v20 }
 0x751   :  { %3646 = vpow2.f32 %v2884_v21 }
 0x752   :  { %3648 = vtanh.f32 %v2314_v8  ;;  %v2895_v8 = vld [vmem:[%s4377_s4] ss:$0 sm:$0xff] }
 0x759   :  { %v3643_v28 = vpop.eup %3642 }
 0x75a   :  { %v3645_v30 = vpop.eup %3644  ;;  %v2322_v35 = vadd.f32 1.0, %v3643_v28 }
 0x75b   :  { %v2328_v36 = vadd.f32 1.0, %v3645_v30  ;;  %v3647_v27 = vpop.eup %3646 }
 0x75c   :  { %3650 = vrcp.f32 %v2322_v35  ;;  %v3649_v41 = vpop.eup %3648  ;;  %v2335_v50 = vadd.f32 1.0, %v3647_v27 }
 0x75d   :  { %3652 = vrcp.f32 %v2328_v36 }
 0x75e   :  { %3654 = vrcp.f32 %v2335_v50 }
 0x766   :  { %v3651_v43 = vpop.eup %3650 }
 0x767   :  { %v3653_v46 = vpop.eup %3652  ;;  %v2339_v49 = vmul.f32 %v3651_v43, %v3649_v41 }
 0x768   :  { %v2338_v55 = vmul.f32 %v3653_v46, %v4202_v48  ;;  %v3655_v61 = vpop.eup %3654 }
 0x76a   :  { %v4269_v56 = vadd.f32 %v2339_v49, %v2338_v55 }
 0x76c   :  { %3656 = vtanh.f32 %v4269_v56 }
 0x776   :  { %v3657_v6 = vpop.eup %3656 }
 0x777   :  { %v2342_v13 = vmul.f32 %v3657_v6, %v3655_v61 }
 0x779   :  { %2416 = vmatmul.mubr.f32.vlgmr.msra.gmra.mrb[20].mxu0 %v2342_v13  ;;  %2487 = vmatmul.mubr.f32.vlgmr.msra.gmra.mrb[16].mxu1 %v2342_v13 }
 0x77a   :  { %2887 = vmatpush1.msk.msra.mxu0 %vm255_vm0, %v4212_v58  ;;  %2560 = vmatprep.mubr.f32.mxu0 %v3703_v0 }
 0x77b   :  { %2890 = vmatpush1.msk.msra.mxu1 %vm255_vm0, %v4220_v52  ;;  %2631 = vmatprep.mubr.f32.mxu1 %v3703_v0  ;;  %v2679_v0 = vld [vmem:[%s4376_s3 + $0x28] sm:$0xff] }
 0x77c   :  { %3477 = vmatprep.subr.bf16.mxu0 %v3476_v16  ;;  %v3484_v45 = vpack.c.bf16 %v2679_v0, %v2678_v44 }
 0x781   :  { %2888 = vmatmul.mubr.msk.f32.vlgmr.msra.gmra.mrb[20].mxu0 %vm251_vm1, %v2885_v33  ;;  %2891 = vmatmul.mubr.msk.f32.vlgmr.msra.gmra.mrb[16].mxu1 %vm251_vm1, %v2885_v33 }
 0x782   :  { %3479 = vmatpush3.bf16.msra.mxu0 %v3476_v16  ;;  %2952 = vmatprep.mubr.f32.mxu0 %v3919_v1  ;;  %v2683_v1 = vld [vmem:[%s4376_s3 + $0x48] sm:$0xff] }
 0x783   :  { %3481 = vmatprep.subr.bf16.mxu0 %v3480_v34  ;;  %v3492_v60 = vpack.c.bf16 %v2683_v1, %v2682_v42 }
 0x786   :  { %3483 = vmatpush3.bf16.msra.mxu0 %v3480_v34 }
 0x787   :  { %3485 = vmatprep.subr.bf16.mxu0 %v3484_v45 }
 0x78a   :  { %3487 = vmatpush3.bf16.msra.mxu0 %v3484_v45 }
 0x78b   :  { %3489 = vmatprep.subr.bf16.mxu0 %v3488_v59 }
 0x78e   :  { %3491 = vmatpush3.bf16.msra.mxu0 %v3488_v59 }
 0x78f   :  { %3493 = vmatprep.subr.bf16.mxu0 %v3492_v60 }
 0x792   :  { %3495 = vmatpush3.bf16.msra.mxu0 %v3492_v60 }
 0x793   :  { %3497 = vmatprep.subr.bf16.mxu0 %v3496_v17 }
 0x796   :  { %3499 = vmatpush3.bf16.msra.mxu0 %v3496_v17 }
 0x797   :  { %3501 = vmatprep.subr.bf16.mxu0 %v3500_v22 }
 0x79a   :  { %3503 = vmatpush3.bf16.msra.mxu0 %v3500_v22 }
 0x79b   :  { %3505 = vmatprep.subr.bf16.mxu0 %v3504_v31 }
 0x79e   :  { %3507 = vmatpush3.bf16.msra.mxu0 %v3504_v31 }
 0x7a1   :  { %2953 = vmatmul.mubr.f32.vlgmr.msra.gmra.mrb[22].mxu0 %v3976_v3 }
 0x7a2   :  { %2955 = vmatprep.mubr.f32.mxu0 %v4034_v10 }
 0x7a5   :  { %2956 = vmatmul.mubr.f32.gmra.mrb[24].mxu0 %v4091_v7 }
 0x7a6   :  { %2958 = vmatprep.mubr.f32.mxu0 %v4148_v2 }
 0x7a9   :  { %2959 = vmatmul.mubr.f32.gmra.mrb[26].mxu0 %v4205_v57 }
 0x7aa   :  { %2961 = vmatprep.mubr.f32.mxu0 %v2342_v13 }
 0x854   :  { %v2562_v32 = vpop.f32.mrb[20].mxu0  ;;  %v2633_v37 = vpop.f32.mrb[16].mxu1 }
 0x855   :  { %v2892_v38 = vmul.f32 -1.442695, %v2562_v32  ;;  %v2564_v39 = vpop.f32.mrb[21].mxu0  ;;  %v2635_v40 = vpop.f32.mrb[17].mxu1 }
 0x856   :  { %v2893_v47 = vmul.f32 -1.442695, %v2564_v39  ;;  %v2894_v48 = vmul.f32 -1.442695, %v2635_v40 }
 0x857   :  { %3658 = vpow2.f32 %v2892_v38 }
 0x858   :  { %3660 = vpow2.f32 %v2893_v47 }
 0x859   :  { %3662 = vpow2.f32 %v2894_v48 }
 0x85a   :  { %3664 = vtanh.f32 %v2633_v37 }
 0x861   :  { %v3659_v51 = vpop.eup %3658 }
 0x862   :  { %v3661_v3 = vpop.eup %3660  ;;  %v2641_v63 = vadd.f32 1.0, %v3659_v51 }
 0x863   :  { %v2647_v10 = vadd.f32 1.0, %v3661_v3  ;;  %v3663_v7 = vpop.eup %3662 }
 0x864   :  { %3666 = vrcp.f32 %v2641_v63  ;;  %v3665_v2 = vpop.eup %3664  ;;  %v2654_v26 = vadd.f32 1.0, %v3663_v7 }
 0x865   :  { %3668 = vrcp.f32 %v2647_v10 }
 0x866   :  { %3670 = vrcp.f32 %v2654_v26 }
 0x86e   :  { %v3667_v57 = vpop.eup %3666 }
 0x86f   :  { %v3669_v58 = vpop.eup %3668  ;;  %v2658_v52 = vmul.f32 %v3667_v57, %v3665_v2 }
 0x870   :  { %v2657_v4 = vmul.f32 %v3669_v58, %v4269_v56  ;;  %v3671_v41 = vpop.eup %3670 }
 0x872   :  { %v2659_v9 = vadd.f32 %v2658_v52, %v2657_v4 }
 0x874   :  { %v2954_v14 = vpop.f32.mrb[22].mxu0  ;;  %3672 = vtanh.f32 %v2659_v9 }
 0x875   :  { %v2769_v15 = vadd.f32 %v2954_v14, %v2895_v8  ;;  %v2763_v20 = vpop.f32.mrb[23].mxu0 }
 0x876   :  { %v2764_v21 = vadd.f32 %v2895_v8, %v2763_v20 }
 0x877   :  { %2804 = vst.msk [vmem:[%s4378_s5 + $0x8] sm:$0xff] %vm2802_vm2, %v2769_v15 }
 0x878   :  { %2803 = vst.msk [vmem:[%s4378_s5] sm:$0xff] %vm2802_vm2, %v2764_v21  ;;  %v2957_v28 = vpop.f32.mrb[24].mxu0 }
 0x879   :  { %v2779_v30 = vadd.f32 %v2957_v28, %v2895_v8  ;;  %v2773_v35 = vpop.f32.mrb[25].mxu0 }
 0x87a   :  { %v2774_v36 = vadd.f32 %v2895_v8, %v2773_v35 }
 0x87b   :  { %2806 = vst.msk [vmem:[%s4378_s5 + $0x18] sm:$0xff] %vm2802_vm2, %v2779_v30 }
 0x87c   :  { %2805 = vst.msk [vmem:[%s4378_s5 + $0x10] sm:$0xff] %vm2802_vm2, %v2774_v36  ;;  %v2960_v27 = vpop.f32.mrb[26].mxu0 }
 0x87d   :  { %v2789_v43 = vadd.f32 %v2960_v27, %v2895_v8  ;;  %v2783_v46 = vpop.f32.mrb[27].mxu0 }
 0x87e   :  { %v3673_v49 = vpop.eup %3672  ;;  %v2784_v50 = vadd.f32 %v2895_v8, %v2783_v46 }
 0x87f   :  { %2808 = vst.msk [vmem:[%s4378_s5 + $0x28] sm:$0xff] %vm2802_vm2, %v2789_v43  ;;  %v2661_v55 = vmul.f32 %v3673_v49, %v3671_v41 }
 0x880   :  { %2807 = vst.msk [vmem:[%s4378_s5 + $0x20] sm:$0xff] %vm2802_vm2, %v2784_v50 }
 0x881   :  { %2962 = vmatmul.mubr.f32.gmra.mrb[28].mxu0 %v2661_v55 }
 0x954   :  { %v2963_v56 = vpop.f32.mrb[28].mxu0 }
 0x955   :  { %v2799_v61 = vadd.f32 %v2963_v56, %v2895_v8  ;;  %v2793_v62 = vpop.f32.mrb[29].mxu0 }
 0x956   :  { %v2794_v5 = vadd.f32 %v2895_v8, %v2793_v62 }
 0x957   :  { %2810 = vst.msk [vmem:[%s4378_s5 + $0x38] sm:$0xff] %vm2802_vm2, %v2799_v61 }
 0x958   :  { %2809 = vst.msk [vmem:[%s4378_s5 + $0x30] sm:$0xff] %vm2802_vm2, %v2794_v5 }
 0x959   :  { %2815 = vsyncpa [#allocation6], 1 }

</bundles_post_ra>
